<compile_context>
chip_gen: v7x
topology: tpu7x:2x2x1
jax: 0.10.0
libtpu: 0.0.40
codegen_flags: <defaults>
</compile_context>

<pallas_src>
import functools

import jax
import jax.numpy as jnp
from jax.experimental import pallas as pl
from jax.experimental.pallas import tpu as pltpu

BN_EPS = 1e-5

_VMEM_LIMIT_CACHE = None


def _vmem_limit_bytes():
    """96 MiB on 128-MiB-VMEM parts (v5e/v6e), 48 MiB on v7x (64 MiB VMEM)."""
    global _VMEM_LIMIT_CACHE
    if _VMEM_LIMIT_CACHE is None:
        try:
            cap = pltpu.get_tpu_info().vmem_capacity_bytes
        except Exception:
            cap = 64 * 1024 * 1024
        _VMEM_LIMIT_CACHE = (96 if cap >= 128 * 1024 * 1024 else 48) * 1024 * 1024
    return _VMEM_LIMIT_CACHE


def _pick_row_tile(h_out, max_rows=8):
    """Largest divisor of h_out that is <= max_rows (no ragged row block).

    Falls back to a single block when no divisor fits or the image is too
    short for the one-row halo window (needs H >= tile + 2)."""
    for t in range(min(max_rows, h_out), 1, -1):
        if h_out % t == 0 and h_out >= t + 2:
            return t
    return h_out


# ----------------------------------------------------------------------------
# Fused InvertedResidual kernel
# ----------------------------------------------------------------------------

def _inverted_residual_kernel(*refs, H, W, Cin, hid, Cout, TRo, n_rb,
                              has_expand, use_shortcut):
    """expand 1x1 (+BN+ReLU6) -> dw 3x3 (+BN+ReLU6) -> proj 1x1 (+BN) [+res].

    Processes one (batch, output-row-tile) grid point.  The hidden activation
    (with its 3x3 halo) lives only in the `hbuf` VMEM scratch:
        hbuf row j  <->  global input row (rb*TRo - 2 + j)
        hbuf col k  <->  global input col (k - 1)
    Out-of-image halo slots are zeroed (conv zero padding); in-image slots are
    written by the expansion matmul.
    """
    if has_expand:
        (x_ref, exp_w_ref, exp_b_ref, dw_w_ref, dw_b_ref,
         proj_w_ref, proj_b_ref, o_ref, hbuf) = refs
    else:
        (x_ref, dw_w_ref, dw_b_ref, proj_w_ref, proj_b_ref, o_ref, hbuf) = refs
        exp_w_ref = exp_b_ref = None

    rb = pl.program_id(1)
    row0 = rb * TRo
    multi = n_rb > 1
    rows = TRo + 2 if multi else H          # input rows fed to the expansion

    # --- zero only the halo slots that are read but never written ----------
    hbuf[:, 0:1, :] = jnp.zeros((TRo + 4, 1, hid), hbuf.dtype)          # left
    hbuf[:, W + 1:W + 2, :] = jnp.zeros((TRo + 4, 1, hid), hbuf.dtype)  # right

    @pl.when(rb == 0)
    def _():                                # rows above the image
        hbuf[0:2, :, :] = jnp.zeros((2, W + 2, hid), hbuf.dtype)

    @pl.when(rb == n_rb - 1)
    def _():                                # rows below the image
        hbuf[TRo + 2:TRo + 4, :, :] = jnp.zeros((2, W + 2, hid), hbuf.dtype)

    # --- expansion 1x1 conv (BN folded) + ReLU6, with a one-row halo -------
    if multi:
        src = jnp.clip(row0 - 1, 0, H - rows)   # clamp read window into image
        dst = src - row0 + 2                    # hbuf row holding global `src`
    else:
        src = 0
        dst = 2

    xs = x_ref[0, pl.ds(src, rows), :, :]       # (rows, W, Cin) bf16
    if has_expand:
        h = jnp.dot(xs.reshape(rows * W, Cin), exp_w_ref[...],
                    preferred_element_type=jnp.float32)
        h = jnp.clip(h + exp_b_ref[...], 0.0, 6.0)          # f32 epilogue
        h = h.reshape(rows, W, hid).astype(hbuf.dtype)
    else:
        h = xs                                  # expand_ratio == 1: hidden = x
    hbuf[pl.ds(dst, rows), 1:W + 1, :] = h

    # --- depthwise 3x3 (stride 1, pad 1), BN folded, ReLU6 ------------------
    w_dw = dw_w_ref[...]                        # (3, 3, hid) f32, loaded once
    acc = jnp.zeros((TRo, W, hid), jnp.float32)
    for dy in range(3):
        for dx in range(3):
            tap = hbuf[dy + 1:dy + 1 + TRo, dx:dx + W, :].astype(jnp.float32)
            acc = acc + tap * w_dw[dy, dx]      # per-tap upcast, accumulate now
    d = jnp.clip(acc + dw_b_ref[...], 0.0, 6.0).astype(jnp.bfloat16)

    # --- projection 1x1 conv + BN (no activation) [+ residual] --------------
    y = jnp.dot(d.reshape(TRo * W, hid), proj_w_ref[...],
                preferred_element_type=jnp.float32)
    y = (y + proj_b_ref[...]).reshape(TRo, W, Cout)
    if use_shortcut:
        y = y + x_ref[0, pl.ds(row0, TRo), :, :].astype(jnp.float32)
    o_ref[0, :, :, :] = y.astype(o_ref.dtype)


def inverted_residual(cfg, params, x, *, max_row_block=8):
    """Fused InvertedResidual forward. x: (N, H, W, Cin) NHWC -> (N, H, W, Cout) bf16."""
    N, H, W, Cin = x.shape
    Cout = cfg["out_channels"]
    hid = cfg["hidden"]
    has_expand = cfg["expand"]
    use_shortcut = cfg["use_shortcut"]

    TRo = _pick_row_tile(H, max_row_block)
    n_rb = H // TRo

    x = x.astype(jnp.bfloat16)

    def _const(shape):
        nd = len(shape)
        return pl.BlockSpec(shape, lambda n, rb, _nd=nd: (0,) * _nd,
                            pipeline_mode=pl.Buffered(1))

    args = [x]
    in_specs = [pl.BlockSpec((1, H, W, Cin), lambda n, rb: (n, 0, 0, 0))]
    if has_expand:
        args += [params["exp_w"], params["exp_b"]]
        in_specs += [_const((Cin, hid)), _const((1, hid))]
    args += [params["dw_w"], params["dw_b"], params["proj_w"], params["proj_b"]]
    in_specs += [_const((3, 3, hid)), _const((1, hid)),
                 _const((hid, Cout)), _const((1, Cout))]

    kernel = functools.partial(
        _inverted_residual_kernel, H=H, W=W, Cin=Cin, hid=hid, Cout=Cout,
        TRo=TRo, n_rb=n_rb, has_expand=has_expand, use_shortcut=use_shortcut)

    return pl.pallas_call(
        kernel,
        grid=(N, n_rb),
        in_specs=in_specs,
        out_specs=pl.BlockSpec((1, TRo, W, Cout), lambda n, rb: (n, rb, 0, 0)),
        out_shape=jax.ShapeDtypeStruct((N, H, W, Cout), jnp.bfloat16),
        scratch_shapes=[pltpu.VMEM((TRo + 4, W + 2, hid), jnp.bfloat16)],
        compiler_params=pltpu.CompilerParams(
            dimension_semantics=("parallel", "parallel"),
            vmem_limit_bytes=_vmem_limit_bytes()),
    )(*args)


# ----------------------------------------------------------------------------
# Parameters (synthetic, deterministic) with BatchNorm folded into the convs
# ----------------------------------------------------------------------------

def init_inverted_residual(key, in_ch, out_ch, stride, expand_ratio):
    hid = in_ch * expand_ratio
    ks = jax.random.split(key, 6)

    def conv_w(k, shape, fan_out):
        return jax.random.normal(k, shape, jnp.float32) * (2.0 / fan_out) ** 0.5

    def bn_fold(k, c):
        k1, k2, k3, k4 = jax.random.split(k, 4)
        gamma = 1.0 + 0.2 * jax.random.normal(k1, (c,), jnp.float32)
        beta = 0.1 * jax.random.normal(k2, (c,), jnp.float32)
        mean = 0.1 * jax.random.normal(k3, (c,), jnp.float32)
        var = 0.8 + 0.4 * jax.random.uniform(k4, (c,), jnp.float32)
        scale = gamma * jax.lax.rsqrt(var + BN_EPS)
        return scale, beta - mean * scale

    params = {}
    if expand_ratio != 1:
        w = conv_w(ks[0], (in_ch, hid), fan_out=hid)      # torch (hid,in,1,1) -> (in,hid)
        s, b = bn_fold(ks[1], hid)
        params["exp_w"] = (w * s[None, :]).astype(jnp.bfloat16)
        params["exp_b"] = b.reshape(1, hid)
    w = conv_w(ks[2], (3, 3, hid), fan_out=9.0)           # torch (hid,1,3,3) -> (3,3,hid)
    s, b = bn_fold(ks[3], hid)
    params["dw_w"] = w * s[None, None, :]                 # f32 (tiny; VPU math)
    params["dw_b"] = b.reshape(1, hid)
    w = conv_w(ks[4], (hid, out_ch), fan_out=out_ch)      # torch (out,hid,1,1) -> (hid,out)
    s, b = bn_fold(ks[5], out_ch)
    params["proj_w"] = (w * s[None, :]).astype(jnp.bfloat16)
    params["proj_b"] = b.reshape(1, out_ch)

    cfg = dict(in_channels=in_ch, out_channels=out_ch, hidden=hid,
               expand=(expand_ratio != 1),
               use_shortcut=(stride == 1 and in_ch == out_ch))
    return cfg, params


# ----------------------------------------------------------------------------
# Pure-JAX reference (mirrors the kernel's bf16 storage points)
# ----------------------------------------------------------------------------

def inverted_residual_reference(cfg, params, x):
    f32 = jnp.float32
    x = x.astype(jnp.bfloat16).astype(f32)
    N, H, W, _ = x.shape
    h = x
    if cfg["expand"]:
        h = jnp.einsum("nhwc,cd->nhwd", x, params["exp_w"].astype(f32))
        h = jnp.clip(h + params["exp_b"].astype(f32), 0.0, 6.0)
    h = h.astype(jnp.bfloat16).astype(f32)
    hp = jnp.pad(h, ((0, 0), (1, 1), (1, 1), (0, 0)))
    acc = jnp.zeros_like(h)
    for dy in range(3):
        for dx in range(3):
            acc = acc + hp[:, dy:dy + H, dx:dx + W, :] * params["dw_w"][dy, dx]
    d = jnp.clip(acc + params["dw_b"], 0.0, 6.0).astype(jnp.bfloat16).astype(f32)
    y = jnp.einsum("nhwc,cd->nhwd", d, params["proj_w"].astype(f32))
    y = y + params["proj_b"]
    if cfg["use_shortcut"]:
        y = y + x
    return y.astype(jnp.bfloat16)


# ----------------------------------------------------------------------------
if __name__ == "__main__":
    key = jax.random.PRNGKey(0)
    kx, k1, k2, k3 = jax.random.split(key, 4)

    # Small NCHW input consistent with the module, transposed to NHWC.
    N, Cin, H, W = 2, 16, 16, 16
    x_nchw = jax.random.normal(kx, (N, Cin, H, W), jnp.float32)
    x = jnp.transpose(x_nchw, (0, 2, 3, 1))

    # Three blocks covering every InvertedResidual code path:
    #   expand_ratio=6 + identity shortcut; expand_ratio=1 (no expansion);
    #   stride=2 (literal module semantics: shortcut off, conv unstrided).
    # The second uses a smaller row tile to also exercise interior row blocks.
    blocks = [
        (init_inverted_residual(k1, 16, 16, stride=1, expand_ratio=6), 8),
        (init_inverted_residual(k2, 16, 24, stride=1, expand_ratio=1), 4),
        (init_inverted_residual(k3, 24, 24, stride=2, expand_ratio=6), 8),
    ]

    cur = x
    for (cfg, params), row_blk in blocks:
        fwd = jax.jit(functools.partial(inverted_residual, cfg,
                                        max_row_block=row_blk))
        out = jax.block_until_ready(fwd(params, cur))
        assert out.shape == (N, H, W, cfg["out_channels"]), out.shape

        ref = inverted_residual_reference(cfg, params, cur)
        o32 = out.astype(jnp.float32)
        r32 = ref.astype(jnp.float32)
        assert bool(jnp.all(jnp.isfinite(o32)))
        err = jnp.abs(o32 - r32)
        tol = 0.1 + 0.02 * jnp.abs(r32)
        assert bool(jnp.all(err <= tol)), float(jnp.max(err - tol))
        cur = out

    print("KERNEL_OK")
</pallas_src>

<mosaic_0001>
module attributes {stable_mosaic.version = 11 : i64} {
  func.func @_inverted_residual_kernel(%arg0: i32, %arg1: i32, %arg2: memref<1x16x16x16xbf16, #tpu.memory_space<vmem>>, %arg3: memref<16x96xbf16, #tpu.memory_space<vmem>>, %arg4: memref<1x96xf32, #tpu.memory_space<vmem>>, %arg5: memref<3x3x96xf32, #tpu.memory_space<vmem>>, %arg6: memref<1x96xf32, #tpu.memory_space<vmem>>, %arg7: memref<96x16xbf16, #tpu.memory_space<vmem>>, %arg8: memref<1x16xf32, #tpu.memory_space<vmem>>, %arg9: memref<1x8x16x16xbf16, #tpu.memory_space<vmem>>, %arg10: memref<12x18x96xbf16, #tpu.memory_space<vmem>>) attributes {dimension_semantics = [#tpu.dimension_semantics<parallel>, #tpu.dimension_semantics<parallel>], iteration_bounds = array<i64: 2, 2>, scalar_prefetch = 0 : i64, scratch_operands = 1 : i64, tpu.core_type = #tpu.core_type<tc>, window_params = [{transform_indices = @transform_0, window_bounds = array<i64: 1, 16, 16, 16>}, {pipeline_mode = #tpu.pipeline_mode<synchronous>, transform_indices = @transform_1, window_bounds = array<i64: 16, 96>}, {pipeline_mode = #tpu.pipeline_mode<synchronous>, transform_indices = @transform_2, window_bounds = array<i64: 1, 96>}, {pipeline_mode = #tpu.pipeline_mode<synchronous>, transform_indices = @transform_3, window_bounds = array<i64: 3, 3, 96>}, {pipeline_mode = #tpu.pipeline_mode<synchronous>, transform_indices = @transform_4, window_bounds = array<i64: 1, 96>}, {pipeline_mode = #tpu.pipeline_mode<synchronous>, transform_indices = @transform_5, window_bounds = array<i64: 96, 16>}, {pipeline_mode = #tpu.pipeline_mode<synchronous>, transform_indices = @transform_6, window_bounds = array<i64: 1, 16>}, {transform_indices = @transform_7, window_bounds = array<i64: 1, 8, 16, 16>}]} {
    %c8_i32 = arith.constant 8 : i32
    %0 = arith.muli %arg1, %c8_i32 : i32
    %cst = arith.constant 0.000000e+00 : bf16
    %1 = vector.broadcast %cst : bf16 to vector<12x1x96xbf16>
    %c0 = arith.constant 0 : index
    %c0_0 = arith.constant 0 : index
    %c0_1 = arith.constant 0 : index
    %2 = vector.load %arg10[%c0, %c0_0, %c0_1] : memref<12x18x96xbf16, #tpu.memory_space<vmem>>, vector<12x1x96xbf16>
    tpu.vector_store %arg10[%c0, %c0_0, %c0_1], %1 {strides = array<i32>} : memref<12x18x96xbf16, #tpu.memory_space<vmem>>, vector<12x1x96xbf16>,
    %cst_2 = arith.constant 0.000000e+00 : bf16
    %3 = vector.broadcast %cst_2 : bf16 to vector<12x1x96xbf16>
    %c0_3 = arith.constant 0 : index
    %c17 = arith.constant 17 : index
    %c0_4 = arith.constant 0 : index
    %4 = vector.load %arg10[%c0_3, %c17, %c0_4] : memref<12x18x96xbf16, #tpu.memory_space<vmem>>, vector<12x1x96xbf16>
    tpu.vector_store %arg10[%c0_3, %c17, %c0_4], %3 {strides = array<i32>} : memref<12x18x96xbf16, #tpu.memory_space<vmem>>, vector<12x1x96xbf16>,
    %c0_i32 = arith.constant 0 : i32
    %5 = arith.cmpi eq, %arg1, %c0_i32 : i32
    %6 = arith.extui %5 : i1 to i32
    %c0_i32_5 = arith.constant 0 : i32
    %7 = arith.cmpi ne, %6, %c0_i32_5 : i32
    scf.if %7 {
      %cst_65 = arith.constant 0.000000e+00 : bf16
      %132 = vector.broadcast %cst_65 : bf16 to vector<2x18x96xbf16>
      %c0_66 = arith.constant 0 : index
      %c0_67 = arith.constant 0 : index
      %c0_68 = arith.constant 0 : index
      %133 = vector.load %arg10[%c0_66, %c0_67, %c0_68] : memref<12x18x96xbf16, #tpu.memory_space<vmem>>, vector<2x18x96xbf16>
      tpu.vector_store %arg10[%c0_66, %c0_67, %c0_68], %132 {strides = array<i32>} : memref<12x18x96xbf16, #tpu.memory_space<vmem>>, vector<2x18x96xbf16>,
    } else {
    }
    %c1_i32 = arith.constant 1 : i32
    %8 = arith.cmpi eq, %arg1, %c1_i32 : i32
    %9 = arith.extui %8 : i1 to i32
    %c0_i32_6 = arith.constant 0 : i32
    %10 = arith.cmpi ne, %9, %c0_i32_6 : i32
    scf.if %10 {
      %cst_65 = arith.constant 0.000000e+00 : bf16
      %132 = vector.broadcast %cst_65 : bf16 to vector<2x18x96xbf16>
      %c10 = arith.constant 10 : index
      %c0_66 = arith.constant 0 : index
      %c0_67 = arith.constant 0 : index
      %133 = vector.load %arg10[%c10, %c0_66, %c0_67] : memref<12x18x96xbf16, #tpu.memory_space<vmem>>, vector<2x18x96xbf16>
      tpu.vector_store %arg10[%c10, %c0_66, %c0_67], %132 {strides = array<i32>} : memref<12x18x96xbf16, #tpu.memory_space<vmem>>, vector<2x18x96xbf16>,
    } else {
    }
    %c1_i32_7 = arith.constant 1 : i32
    %11 = arith.subi %0, %c1_i32_7 : i32
    %c0_i32_8 = arith.constant 0 : i32
    %c6_i32 = arith.constant 6 : i32
    %12 = arith.maxsi %c0_i32_8, %11 : i32
    %13 = arith.minsi %c6_i32, %12 : i32
    %14 = arith.subi %13, %0 : i32
    %c2_i32 = arith.constant 2 : i32
    %15 = arith.addi %14, %c2_i32 : i32
    %c0_9 = arith.constant 0 : index
    %16 = arith.index_cast %13 : i32 to index
    %c0_10 = arith.constant 0 : index
    %c0_11 = arith.constant 0 : index
    %17 = vector.load %arg2[%c0_9, %16, %c0_10, %c0_11] : memref<1x16x16x16xbf16, #tpu.memory_space<vmem>>, vector<1x10x16x16xbf16>
    %18 = vector.shape_cast %17 : vector<1x10x16x16xbf16> to vector<10x16x16xbf16>
    %19 = vector.shape_cast %18 : vector<10x16x16xbf16> to vector<160x16xbf16>
    %c0_12 = arith.constant 0 : index
    %c0_13 = arith.constant 0 : index
    %20 = vector.load %arg3[%c0_12, %c0_13] : memref<16x96xbf16, #tpu.memory_space<vmem>>, vector<16x96xbf16>
    %cst_14 = arith.constant dense<0.000000e+00> : vector<160x96xf32>
    %21 = tpu.matmul %19, %20, %cst_14 {dimension_numbers = #tpu.dot_dimension_numbers<[1], [0], [0], [1], [0, 0, 1, 1], [], []>} : vector<160x16xbf16>, vector<16x96xbf16>, vector<160x96xf32> -> vector<160x96xf32>
    %c0_15 = arith.constant 0 : index
    %c0_16 = arith.constant 0 : index
    %22 = vector.load %arg4[%c0_15, %c0_16] : memref<1x96xf32, #tpu.memory_space<vmem>>, vector<1x96xf32>
    %23 = vector.broadcast %22 : vector<1x96xf32> to vector<160x96xf32>
    %24 = arith.addf %21, %23 : vector<160x96xf32>
    %cst_17 = arith.constant 0.000000e+00 : f32
    %cst_18 = arith.constant 6.000000e+00 : f32
    %25 = vector.broadcast %cst_17 : f32 to vector<160x96xf32>
    %26 = arith.maximumf %25, %24 : vector<160x96xf32>
    %27 = vector.broadcast %cst_18 : f32 to vector<160x96xf32>
    %28 = arith.minimumf %27, %26 : vector<160x96xf32>
    %29 = vector.shape_cast %28 : vector<160x96xf32> to vector<10x16x96xf32>
    %30 = arith.truncf %29 : vector<10x16x96xf32> to vector<10x16x96xbf16>
    %31 = arith.index_cast %15 : i32 to index
    %c1 = arith.constant 1 : index
    %c0_19 = arith.constant 0 : index
    %32 = vector.load %arg10[%31, %c1, %c0_19] : memref<12x18x96xbf16, #tpu.memory_space<vmem>>, vector<10x16x96xbf16>
    tpu.vector_store %arg10[%31, %c1, %c0_19], %30 {strides = array<i32>} : memref<12x18x96xbf16, #tpu.memory_space<vmem>>, vector<10x16x96xbf16>,
    %c0_20 = arith.constant 0 : index
    %c0_21 = arith.constant 0 : index
    %c0_22 = arith.constant 0 : index
    %33 = vector.load %arg5[%c0_20, %c0_21, %c0_22] : memref<3x3x96xf32, #tpu.memory_space<vmem>>, vector<3x3x96xf32>
    %cst_23 = arith.constant 0.000000e+00 : f32
    %34 = vector.broadcast %cst_23 : f32 to vector<8x16x96xf32>
    %c1_24 = arith.constant 1 : index
    %c0_25 = arith.constant 0 : index
    %c0_26 = arith.constant 0 : index
    %35 = vector.load %arg10[%c1_24, %c0_25, %c0_26] : memref<12x18x96xbf16, #tpu.memory_space<vmem>>, vector<8x16x96xbf16>
    %36 = arith.extf %35 : vector<8x16x96xbf16> to vector<8x16x96xf32>
    %37 = vector.extract_strided_slice %33 {offsets = [0, 0, 0], sizes = [1, 1, 96], strides = [1, 1, 1]} : vector<3x3x96xf32> to vector<1x1x96xf32>
    %38 = vector.shape_cast %37 : vector<1x1x96xf32> to vector<96xf32>
    %39 = vector.shape_cast %38 : vector<96xf32> to vector<1x1x96xf32>
    %40 = vector.broadcast %39 : vector<1x1x96xf32> to vector<8x16x96xf32>
    %41 = arith.mulf %36, %40 : vector<8x16x96xf32>
    %42 = arith.addf %34, %41 : vector<8x16x96xf32>
    %c1_27 = arith.constant 1 : index
    %c1_28 = arith.constant 1 : index
    %c0_29 = arith.constant 0 : index
    %43 = vector.load %arg10[%c1_27, %c1_28, %c0_29] : memref<12x18x96xbf16, #tpu.memory_space<vmem>>, vector<8x16x96xbf16>
    %44 = arith.extf %43 : vector<8x16x96xbf16> to vector<8x16x96xf32>
    %45 = vector.extract_strided_slice %33 {offsets = [0, 1, 0], sizes = [1, 1, 96], strides = [1, 1, 1]} : vector<3x3x96xf32> to vector<1x1x96xf32>
    %46 = vector.shape_cast %45 : vector<1x1x96xf32> to vector<96xf32>
    %47 = vector.shape_cast %46 : vector<96xf32> to vector<1x1x96xf32>
    %48 = vector.broadcast %47 : vector<1x1x96xf32> to vector<8x16x96xf32>
    %49 = arith.mulf %44, %48 : vector<8x16x96xf32>
    %50 = arith.addf %42, %49 : vector<8x16x96xf32>
    %c1_30 = arith.constant 1 : index
    %c2 = arith.constant 2 : index
    %c0_31 = arith.constant 0 : index
    %51 = vector.load %arg10[%c1_30, %c2, %c0_31] : memref<12x18x96xbf16, #tpu.memory_space<vmem>>, vector<8x16x96xbf16>
    %52 = arith.extf %51 : vector<8x16x96xbf16> to vector<8x16x96xf32>
    %53 = vector.extract_strided_slice %33 {offsets = [0, 2, 0], sizes = [1, 1, 96], strides = [1, 1, 1]} : vector<3x3x96xf32> to vector<1x1x96xf32>
    %54 = vector.shape_cast %53 : vector<1x1x96xf32> to vector<96xf32>
    %55 = vector.shape_cast %54 : vector<96xf32> to vector<1x1x96xf32>
    %56 = vector.broadcast %55 : vector<1x1x96xf32> to vector<8x16x96xf32>
    %57 = arith.mulf %52, %56 : vector<8x16x96xf32>
    %58 = arith.addf %50, %57 : vector<8x16x96xf32>
    %c2_32 = arith.constant 2 : index
    %c0_33 = arith.constant 0 : index
    %c0_34 = arith.constant 0 : index
    %59 = vector.load %arg10[%c2_32, %c0_33, %c0_34] : memref<12x18x96xbf16, #tpu.memory_space<vmem>>, vector<8x16x96xbf16>
    %60 = arith.extf %59 : vector<8x16x96xbf16> to vector<8x16x96xf32>
    %61 = vector.extract_strided_slice %33 {offsets = [1, 0, 0], sizes = [1, 1, 96], strides = [1, 1, 1]} : vector<3x3x96xf32> to vector<1x1x96xf32>
    %62 = vector.shape_cast %61 : vector<1x1x96xf32> to vector<96xf32>
    %63 = vector.shape_cast %62 : vector<96xf32> to vector<1x1x96xf32>
    %64 = vector.broadcast %63 : vector<1x1x96xf32> to vector<8x16x96xf32>
    %65 = arith.mulf %60, %64 : vector<8x16x96xf32>
    %66 = arith.addf %58, %65 : vector<8x16x96xf32>
    %c2_35 = arith.constant 2 : index
    %c1_36 = arith.constant 1 : index
    %c0_37 = arith.constant 0 : index
    %67 = vector.load %arg10[%c2_35, %c1_36, %c0_37] : memref<12x18x96xbf16, #tpu.memory_space<vmem>>, vector<8x16x96xbf16>
    %68 = arith.extf %67 : vector<8x16x96xbf16> to vector<8x16x96xf32>
    %69 = vector.extract_strided_slice %33 {offsets = [1, 1, 0], sizes = [1, 1, 96], strides = [1, 1, 1]} : vector<3x3x96xf32> to vector<1x1x96xf32>
    %70 = vector.shape_cast %69 : vector<1x1x96xf32> to vector<96xf32>
    %71 = vector.shape_cast %70 : vector<96xf32> to vector<1x1x96xf32>
    %72 = vector.broadcast %71 : vector<1x1x96xf32> to vector<8x16x96xf32>
    %73 = arith.mulf %68, %72 : vector<8x16x96xf32>
    %74 = arith.addf %66, %73 : vector<8x16x96xf32>
    %c2_38 = arith.constant 2 : index
    %c2_39 = arith.constant 2 : index
    %c0_40 = arith.constant 0 : index
    %75 = vector.load %arg10[%c2_38, %c2_39, %c0_40] : memref<12x18x96xbf16, #tpu.memory_space<vmem>>, vector<8x16x96xbf16>
    %76 = arith.extf %75 : vector<8x16x96xbf16> to vector<8x16x96xf32>
    %77 = vector.extract_strided_slice %33 {offsets = [1, 2, 0], sizes = [1, 1, 96], strides = [1, 1, 1]} : vector<3x3x96xf32> to vector<1x1x96xf32>
    %78 = vector.shape_cast %77 : vector<1x1x96xf32> to vector<96xf32>
    %79 = vector.shape_cast %78 : vector<96xf32> to vector<1x1x96xf32>
    %80 = vector.broadcast %79 : vector<1x1x96xf32> to vector<8x16x96xf32>
    %81 = arith.mulf %76, %80 : vector<8x16x96xf32>
    %82 = arith.addf %74, %81 : vector<8x16x96xf32>
    %c3 = arith.constant 3 : index
    %c0_41 = arith.constant 0 : index
    %c0_42 = arith.constant 0 : index
    %83 = vector.load %arg10[%c3, %c0_41, %c0_42] : memref<12x18x96xbf16, #tpu.memory_space<vmem>>, vector<8x16x96xbf16>
    %84 = arith.extf %83 : vector<8x16x96xbf16> to vector<8x16x96xf32>
    %85 = vector.extract_strided_slice %33 {offsets = [2, 0, 0], sizes = [1, 1, 96], strides = [1, 1, 1]} : vector<3x3x96xf32> to vector<1x1x96xf32>
    %86 = vector.shape_cast %85 : vector<1x1x96xf32> to vector<96xf32>
    %87 = vector.shape_cast %86 : vector<96xf32> to vector<1x1x96xf32>
    %88 = vector.broadcast %87 : vector<1x1x96xf32> to vector<8x16x96xf32>
    %89 = arith.mulf %84, %88 : vector<8x16x96xf32>
    %90 = arith.addf %82, %89 : vector<8x16x96xf32>
    %c3_43 = arith.constant 3 : index
    %c1_44 = arith.constant 1 : index
    %c0_45 = arith.constant 0 : index
    %91 = vector.load %arg10[%c3_43, %c1_44, %c0_45] : memref<12x18x96xbf16, #tpu.memory_space<vmem>>, vector<8x16x96xbf16>
    %92 = arith.extf %91 : vector<8x16x96xbf16> to vector<8x16x96xf32>
    %93 = vector.extract_strided_slice %33 {offsets = [2, 1, 0], sizes = [1, 1, 96], strides = [1, 1, 1]} : vector<3x3x96xf32> to vector<1x1x96xf32>
    %94 = vector.shape_cast %93 : vector<1x1x96xf32> to vector<96xf32>
    %95 = vector.shape_cast %94 : vector<96xf32> to vector<1x1x96xf32>
    %96 = vector.broadcast %95 : vector<1x1x96xf32> to vector<8x16x96xf32>
    %97 = arith.mulf %92, %96 : vector<8x16x96xf32>
    %98 = arith.addf %90, %97 : vector<8x16x96xf32>
    %c3_46 = arith.constant 3 : index
    %c2_47 = arith.constant 2 : index
    %c0_48 = arith.constant 0 : index
    %99 = vector.load %arg10[%c3_46, %c2_47, %c0_48] : memref<12x18x96xbf16, #tpu.memory_space<vmem>>, vector<8x16x96xbf16>
    %100 = arith.extf %99 : vector<8x16x96xbf16> to vector<8x16x96xf32>
    %101 = vector.extract_strided_slice %33 {offsets = [2, 2, 0], sizes = [1, 1, 96], strides = [1, 1, 1]} : vector<3x3x96xf32> to vector<1x1x96xf32>
    %102 = vector.shape_cast %101 : vector<1x1x96xf32> to vector<96xf32>
    %103 = vector.shape_cast %102 : vector<96xf32> to vector<1x1x96xf32>
    %104 = vector.broadcast %103 : vector<1x1x96xf32> to vector<8x16x96xf32>
    %105 = arith.mulf %100, %104 : vector<8x16x96xf32>
    %106 = arith.addf %98, %105 : vector<8x16x96xf32>
    %c0_49 = arith.constant 0 : index
    %c0_50 = arith.constant 0 : index
    %107 = vector.load %arg6[%c0_49, %c0_50] : memref<1x96xf32, #tpu.memory_space<vmem>>, vector<1x96xf32>
    %108 = vector.shape_cast %107 : vector<1x96xf32> to vector<1x1x96xf32>
    %109 = vector.broadcast %108 : vector<1x1x96xf32> to vector<8x16x96xf32>
    %110 = arith.addf %106, %109 : vector<8x16x96xf32>
    %cst_51 = arith.constant 0.000000e+00 : f32
    %cst_52 = arith.constant 6.000000e+00 : f32
    %111 = vector.broadcast %cst_51 : f32 to vector<8x16x96xf32>
    %112 = arith.maximumf %111, %110 : vector<8x16x96xf32>
    %113 = vector.broadcast %cst_52 : f32 to vector<8x16x96xf32>
    %114 = arith.minimumf %113, %112 : vector<8x16x96xf32>
    %115 = arith.truncf %114 : vector<8x16x96xf32> to vector<8x16x96xbf16>
    %116 = vector.shape_cast %115 : vector<8x16x96xbf16> to vector<128x96xbf16>
    %c0_53 = arith.constant 0 : index
    %c0_54 = arith.constant 0 : index
    %117 = vector.load %arg7[%c0_53, %c0_54] : memref<96x16xbf16, #tpu.memory_space<vmem>>, vector<96x16xbf16>
    %cst_55 = arith.constant dense<0.000000e+00> : vector<128x16xf32>
    %118 = tpu.matmul %116, %117, %cst_55 {dimension_numbers = #tpu.dot_dimension_numbers<[1], [0], [0], [1], [0, 0, 1, 1], [], []>} : vector<128x96xbf16>, vector<96x16xbf16>, vector<128x16xf32> -> vector<128x16xf32>
    %c0_56 = arith.constant 0 : index
    %c0_57 = arith.constant 0 : index
    %119 = vector.load %arg8[%c0_56, %c0_57] : memref<1x16xf32, #tpu.memory_space<vmem>>, vector<1x16xf32>
    %120 = vector.broadcast %119 : vector<1x16xf32> to vector<128x16xf32>
    %121 = arith.addf %118, %120 : vector<128x16xf32>
    %122 = vector.shape_cast %121 : vector<128x16xf32> to vector<8x16x16xf32>
    %c0_58 = arith.constant 0 : index
    %123 = arith.index_cast %0 : i32 to index
    %c0_59 = arith.constant 0 : index
    %c0_60 = arith.constant 0 : index
    %124 = vector.load %arg2[%c0_58, %123, %c0_59, %c0_60] : memref<1x16x16x16xbf16, #tpu.memory_space<vmem>>, vector<1x8x16x16xbf16>
    %125 = vector.shape_cast %124 : vector<1x8x16x16xbf16> to vector<8x16x16xbf16>
    %126 = arith.extf %125 : vector<8x16x16xbf16> to vector<8x16x16xf32>
    %127 = arith.addf %122, %126 : vector<8x16x16xf32>
    %128 = arith.truncf %127 : vector<8x16x16xf32> to vector<8x16x16xbf16>
    %c0_61 = arith.constant 0 : index
    %c0_62 = arith.constant 0 : index
    %c0_63 = arith.constant 0 : index
    %c0_64 = arith.constant 0 : index
    %129 = vector.load %arg9[%c0_61, %c0_62, %c0_63, %c0_64] : memref<1x8x16x16xbf16, #tpu.memory_space<vmem>>, vector<1x8x16x16xbf16>
    %130 = vector.shape_cast %129 : vector<1x8x16x16xbf16> to vector<8x16x16xbf16>
    %131 = vector.shape_cast %128 : vector<8x16x16xbf16> to vector<1x8x16x16xbf16>
    tpu.vector_store %arg9[%c0_61, %c0_62, %c0_63, %c0_64], %131 {strides = array<i32>} : memref<1x8x16x16xbf16, #tpu.memory_space<vmem>>, vector<1x8x16x16xbf16>,
    return
  }
  func.func @transform_0(%arg0: i32, %arg1: i32) -> (i32, i32, i32, i32) {
    %c0_i32 = arith.constant 0 : i32
    %c0_i32_0 = arith.constant 0 : i32
    %c0_i32_1 = arith.constant 0 : i32
    %c0_i32_2 = arith.constant 0 : i32
    return %arg0, %c0_i32, %c0_i32_0, %c0_i32_1 : i32, i32, i32, i32
  }
  func.func @transform_1(%arg0: i32, %arg1: i32) -> (i32, i32) {
    %c0_i32 = arith.constant 0 : i32
    %c0_i32_0 = arith.constant 0 : i32
    %c0_i32_1 = arith.constant 0 : i32
    return %c0_i32, %c0_i32_0 : i32, i32
  }
  func.func @transform_2(%arg0: i32, %arg1: i32) -> (i32, i32) {
    %c0_i32 = arith.constant 0 : i32
    %c0_i32_0 = arith.constant 0 : i32
    %c0_i32_1 = arith.constant 0 : i32
    return %c0_i32, %c0_i32_0 : i32, i32
  }
  func.func @transform_3(%arg0: i32, %arg1: i32) -> (i32, i32, i32) {
    %c0_i32 = arith.constant 0 : i32
    %c0_i32_0 = arith.constant 0 : i32
    %c0_i32_1 = arith.constant 0 : i32
    %c0_i32_2 = arith.constant 0 : i32
    return %c0_i32, %c0_i32_0, %c0_i32_1 : i32, i32, i32
  }
  func.func @transform_4(%arg0: i32, %arg1: i32) -> (i32, i32) {
    %c0_i32 = arith.constant 0 : i32
    %c0_i32_0 = arith.constant 0 : i32
    %c0_i32_1 = arith.constant 0 : i32
    return %c0_i32, %c0_i32_0 : i32, i32
  }
  func.func @transform_5(%arg0: i32, %arg1: i32) -> (i32, i32) {
    %c0_i32 = arith.constant 0 : i32
    %c0_i32_0 = arith.constant 0 : i32
    %c0_i32_1 = arith.constant 0 : i32
    return %c0_i32, %c0_i32_0 : i32, i32
  }
  func.func @transform_6(%arg0: i32, %arg1: i32) -> (i32, i32) {
    %c0_i32 = arith.constant 0 : i32
    %c0_i32_0 = arith.constant 0 : i32
    %c0_i32_1 = arith.constant 0 : i32
    return %c0_i32, %c0_i32_0 : i32, i32
  }
  func.func @transform_7(%arg0: i32, %arg1: i32) -> (i32, i32, i32, i32) {
    %c0_i32 = arith.constant 0 : i32
    %c0_i32_0 = arith.constant 0 : i32
    %c0_i32_1 = arith.constant 0 : i32
    return %arg0, %arg1, %c0_i32, %c0_i32_0 : i32, i32, i32, i32
  }
}

</mosaic_0001>

<bundles_post_ra>
// kernel: inverted_residual.1
= control target key start
LH: loop header
LB: loop body
LE: loop exit
PB: predicated region body
PF: predicated region fallthrough
CT: control target
= control target key end

     0   :  { %s4051_s0 = inlined_call_operand.vmem [shape: bf16[2,16,16,16], index: 0, kind: input, shape index: {}]   ;;  %s4052_s1 = inlined_call_operand.vmem [shape: bf16[16,96], index: 1, kind: input, shape index: {}]   ;;  %s4053_s2 = inlined_call_operand.vmem [shape: f32[1,96], index: 2, kind: input, shape index: {}]   ;;  %s4054_s3 = inlined_call_operand.vmem [shape: f32[3,3,96], index: 3, kind: input, shape index: {}]   ;;  %s4055_s4 = inlined_call_operand.vmem [shape: f32[1,96], index: 4, kind: input, shape index: {}]   ;;  %s4056_s5 = inlined_call_operand.vmem [shape: bf16[96,16], index: 5, kind: input, shape index: {}]   ;;  %s4057_s6 = inlined_call_operand.vmem [shape: f32[1,16], index: 6, kind: input, shape index: {}]   ;;  %s4058_s7 = inlined_call_operand.hbm [shape: bf16[2,16,16,16], index: 7, kind: output, shape index: {}]  }
   0x1   :  { %4061 = sst [smem:[#allocation6_spill]] %s4051_s0 }
   0x2   :  { %12 = vsyncpa [#allocation4], 0 }
   0x3   :  { %14 = vsyncpa [#allocation4 + $0x1], 0  ;;  %s3139_s24 = smov 0   ;;  %s3141_s25 = smov 0  }
   0x4   :  { %s3143_s26 = smov 0   ;;  %s3145_s27 = smov 0  }
   0x5   :  { %s3147_s28 = smov 0   ;;  %s3149_s29 = smov 0  }
   0x6   :  { %s3151_s30 = smov 0   ;;  %s3153_s8 = smov 0  }
   0x7 LB: > { %s2537_s9 = sadd.s32 4294967295, %s3092_s8   ;;  %s2538_s10 = sadd.s32 4294967294, %s3092_s8   ;;  %s3092_s8 = sphi %s3153_s8, %s20_s8   ;;  %s3088_s30 = sphi %s3151_s30, %s4081_s30   ;;  %s3084_s29 = sphi %s3149_s29, %s4080_s29   ;;  %s3080_s28 = sphi %s3147_s28, %s4079_s28   ;;  %s3076_s27 = sphi %s3145_s27, %s4078_s27   ;;  %s3072_s26 = sphi %s3143_s26, %s4077_s26   ;;  %s3068_s25 = sphi %s3141_s25, %s4076_s25   ;;  %s3064_s24 = sphi %s3139_s24, %s4075_s24  }
   0x8   : > { %s29_s11 = sadd.s32 1, %s3084_s29  ;;  %s32_s12 = sadd.s32 1, %s3088_s30 }
   0x9   : > { %p30_p0 = scmp.ge.s32.totalorder %s29_s11, 2  ;;  %p203_p1 = scmp.ne.s32.totalorder %s3072_s26, %s3068_s25 }
   0xa   : > { %p204_p2 = scmp.eq.s32.totalorder %s2537_s9, 3  ;;  %p209_p5 = scmp.ne.s32.totalorder %s3068_s25, %s3064_s24 }
   0xb   : > { %s4083_s11 = smov (%p30_p0, %s29_s11), 0  ;;  %s4085_s12 = smov (!%p30_p0, %s32_s12), %s3088_s30 }
   0xc   : > { %s189_s13 = ssub.s32 %s3084_s29, %s4083_s11  ;;  %p3190_p3 = por %p204_p2, %p203_p1 }
   0xd   : > { %p34_p4 = scmp.ge.s32.totalorder %s4085_s12, 2  ;;  %p210_p6 = scmp.eq.s32.totalorder %s2538_s10, 3 }
   0xe   : > { %p2541_p7 = scmp.ge.s32.totalorder %s3092_s8, 1  ;;  %p254_p9 = scmp.lt.s32.totalorder %s3092_s8, 5 }
   0xf   : > { %s4087_s12 = smov (%p34_p4, %s4085_s12), 0  ;;  %p3199_p8 = por %p210_p6, %p209_p5 }
  0x10   : > { %s188_s16 = ssub.s32 %s3088_s30, %s4087_s12  ;;  %s193_s17 = sadd.s32 1, %s3072_s26 }
  0x11   : > { %s190_s18 = sor.u32 %s189_s13, %s188_s16  ;;  %p255_p10 = pnand %p2541_p7, %p254_p9 }
  0x12   : > { %p191_p11 = scmp.eq.s32.totalorder %s190_s18, 0  ;;  %s4059_s20 = sand.u32 (!%p255_p10), 1, %s3068_s25   ;;  %vm294_vm0 = vcmask (!%p255_p10), 778240   ;;  %vm295_vm1 = vsmask.f32 (!%p255_p10), 256 }
  0x13   : > { %258 = sbr.rel (%p255_p10) target bundleno = 768 (0x300), region = 48  ;;  %p286_p12 = scmp.lt.s32.totalorder (!%p255_p10), %s3080_s28, 1  ;;  %vm3219_vm2 = vmand (!%p255_p10), %vm294_vm0, %vm295_vm1  ;;  %v297_v1 = vld [vmem:[#allocation2] sm:$0x1] (!%p255_p10)  ;;  %v300_v2 = vld [vmem:[#allocation2 + $0xc] sm:$0x1] (!%p255_p10) }
  0x14   : > { %s3208_s19 = scalar_select %p191_p11, %s3072_s26, %s193_s17  }
  0x15   : > { %s3214_s21 = sshll.u32 (!%p255_p10), %s4059_s20, 6  ;;  %s4060_s22 = sshll.u32 (!%p255_p10), %s3076_s27, 3  ;;  %v298_v3 = vsel (!%p255_p10), %vm3219_vm2, 0, %v297_v1  ;;  %v301_v4 = vsel (!%p255_p10), %vm3219_vm2, 0, %v300_v2  ;;  %v303_v5 = vld [vmem:[#allocation2 + $0x18] sm:$0x1] (!%p255_p10) }
  0x16   : > { %299 = vst [vmem:[#allocation2] sm:$0x1] (!%p255_p10), %v298_v3  ;;  %302 = vst [vmem:[#allocation2 + $0xc] sm:$0x1] (!%p255_p10), %v301_v4  ;;  %v304_v6 = vsel (!%p255_p10), %vm3219_vm2, 0, %v303_v5  ;;  %s4066_s0 = sld [smem:[#allocation6_spill]] (!%p255_p10) }
  0x17   : > { %v306_v7 = vld [vmem:[#allocation2 + $0x24] sm:$0x1] (!%p255_p10)  ;;  %v309_v8 = vld [vmem:[#allocation2 + $0x30] sm:$0x1] (!%p255_p10)  ;;  %305 = vst [vmem:[#allocation2 + $0x18] sm:$0x1] (!%p255_p10), %v304_v6 }
  0x18   : > { %v307_v9 = vsel (!%p255_p10), %vm3219_vm2, 0, %v306_v7  ;;  %v310_v10 = vsel (!%p255_p10), %vm3219_vm2, 0, %v309_v8  ;;  %v312_v11 = vld [vmem:[#allocation2 + $0x3c] sm:$0x1] (!%p255_p10)  ;;  %v315_v12 = vld [vmem:[#allocation2 + $0x48] sm:$0x1] (!%p255_p10) }
  0x19   : > { %308 = vst [vmem:[#allocation2 + $0x24] sm:$0x1] (!%p255_p10), %v307_v9  ;;  %311 = vst [vmem:[#allocation2 + $0x30] sm:$0x1] (!%p255_p10), %v310_v10  ;;  %v313_v13 = vsel (!%p255_p10), %vm3219_vm2, 0, %v312_v11  ;;  %v316_v14 = vsel (!%p255_p10), %vm3219_vm2, 0, %v315_v12 }
  0x1a   : > { %s287_s23 = scalar_select %p286_p12, %s3080_s28, 1  ;;  %v318_v15 = vld [vmem:[#allocation2 + $0x54] sm:$0x1]  ;;  %314 = vst [vmem:[#allocation2 + $0x3c] sm:$0x1] %v313_v13 }
  0x1b   : > { %317 = vst [vmem:[#allocation2 + $0x48] sm:$0x1] %v316_v14  ;;  %v319_v16 = vsel %vm3219_vm2, 0, %v318_v15  ;;  %v321_v17 = vld [vmem:[#allocation2 + $0x60] sm:$0x1]  ;;  %s3284_s17 = scalar_lea.vmem [#allocation3], %s3214_s21 }
  0x1c   : > { %s2689_s9 = sshll.u32 %s287_s23, 7  ;;  %v324_v18 = vld [vmem:[#allocation2 + $0x6c] sm:$0x1]  ;;  %320 = vst [vmem:[#allocation2 + $0x54] sm:$0x1] %v319_v16  ;;  %v322_v19 = vsel %vm3219_vm2, 0, %v321_v17 }
  0x1d   : > { %s3241_s16 = scalar_lea.vmem %s4066_s0, %s2689_s9  ;;  %v325_v20 = vsel %vm3219_vm2, 0, %v324_v18  ;;  %v327_v21 = vld [vmem:[#allocation2 + $0x78] sm:$0x1]  ;;  %v330_v22 = vld [vmem:[#allocation2 + $0x84] sm:$0x1]  ;;  %p2546_p13 = scmp.ne.s32.totalorder %s3076_s27, 0 }
  0x1e   : > { %323 = vst [vmem:[#allocation2 + $0x60] sm:$0x1] %v322_v19  ;;  %326 = vst [vmem:[#allocation2 + $0x6c] sm:$0x1] %v325_v20  ;;  %v328_v23 = vsel %vm3219_vm2, 0, %v327_v21  ;;  %v331_v24 = vsel %vm3219_vm2, 0, %v330_v22 }
  0x1f   : > { %vm333_vm3 = vsmask.f32 7938  ;;  %v335_v25 = vld [vmem:[#allocation2 + $0x8] sm:$0x1]  ;;  %329 = vst [vmem:[#allocation2 + $0x78] sm:$0x1] %v328_v23 }
  0x20   : > { %332 = vst [vmem:[#allocation2 + $0x84] sm:$0x1] %v331_v24  ;;  %vm3255_vm4 = vmand %vm294_vm0, %vm333_vm3  ;;  %v338_v27 = vld [vmem:[#allocation2 + $0x14] sm:$0x1]  ;;  %v341_v28 = vld [vmem:[#allocation2 + $0x20] sm:$0x1] }
  0x21   : > { %v336_v29 = vsel %vm3255_vm4, 0, %v335_v25  ;;  %v339_v30 = vsel %vm3255_vm4, 0, %v338_v27  ;;  %v342_v31 = vsel %vm3255_vm4, 0, %v341_v28  ;;  %v344_v32 = vld [vmem:[#allocation2 + $0x2c] sm:$0x1]  ;;  %vm375_vm5 = vcmask (!%p2546_p13), 781312  }
  0x22   : > { %337 = vst [vmem:[#allocation2 + $0x8] sm:$0x1] %v336_v29  ;;  %340 = vst [vmem:[#allocation2 + $0x14] sm:$0x1] %v339_v30  ;;  %v345_v33 = vsel %vm3255_vm4, 0, %v344_v32  ;;  %v3094_v50 = vmov (!%p2546_p13), 0  }
  0x23   : > { %343 = vst [vmem:[#allocation2 + $0x20] sm:$0x1] %v342_v31  ;;  %v347_v34 = vld [vmem:[#allocation2 + $0x38] sm:$0x1]  ;;  %v350_v35 = vld [vmem:[#allocation2 + $0x44] sm:$0x1] }
  0x24   : > { %346 = vst [vmem:[#allocation2 + $0x2c] sm:$0x1] %v345_v33  ;;  %v348_v36 = vsel %vm3255_vm4, 0, %v347_v34  ;;  %v351_v37 = vsel %vm3255_vm4, 0, %v350_v35  ;;  %v353_v38 = vld [vmem:[#allocation2 + $0x50] sm:$0x1] }
  0x25   : > { %v356_v39 = vld [vmem:[#allocation2 + $0x5c] sm:$0x1]  ;;  %349 = vst [vmem:[#allocation2 + $0x38] sm:$0x1] %v348_v36  ;;  %352 = vst [vmem:[#allocation2 + $0x44] sm:$0x1] %v351_v37 }
  0x26   : > { %v354_v40 = vsel %vm3255_vm4, 0, %v353_v38  ;;  %v357_v41 = vsel %vm3255_vm4, 0, %v356_v39  ;;  %v359_v42 = vld [vmem:[#allocation2 + $0x68] sm:$0x1]  ;;  %v362_v43 = vld [vmem:[#allocation2 + $0x74] sm:$0x1] }
  0x27   : > { %355 = vst [vmem:[#allocation2 + $0x50] sm:$0x1] %v354_v40  ;;  %358 = vst [vmem:[#allocation2 + $0x5c] sm:$0x1] %v357_v41  ;;  %v360_v44 = vsel %vm3255_vm4, 0, %v359_v42  ;;  %v363_v45 = vsel %vm3255_vm4, 0, %v362_v43 }
  0x28   : > { %v365_v46 = vld [vmem:[#allocation2 + $0x80] sm:$0x1]  ;;  %v368_v47 = vld [vmem:[#allocation2 + $0x8c] sm:$0x1]  ;;  %361 = vst [vmem:[#allocation2 + $0x68] sm:$0x1] %v360_v44 }
  0x29   : > { %364 = vst [vmem:[#allocation2 + $0x74] sm:$0x1] %v363_v45  ;;  %v366_v48 = vsel %vm3255_vm4, 0, %v365_v46  ;;  %v369_v49 = vsel %vm3255_vm4, 0, %v368_v47  ;;  %374 = sbr.rel (%p2546_p13) target bundleno = 48 (0x30), region = 52 }
  0x2a   : > { %367 = vst [vmem:[#allocation2 + $0x80] sm:$0x1] %v366_v48  ;;  %370 = vst [vmem:[#allocation2 + $0x8c] sm:$0x1] %v369_v49 }
  0x2b   : > { %376 = vst.msk [vmem:[#allocation2] sm:$0xf] (!%p2546_p13), %vm375_vm5, %v3094_v50  ;;  %377 = vst.msk [vmem:[#allocation2 + $0x4] sm:$0xf] (!%p2546_p13), %vm375_vm5, %v3094_v50 }
  0x2c   : > { %379 = vst.msk [vmem:[#allocation2 + $0x8] sm:$0x1] (!%p2546_p13), %vm294_vm0, %v3094_v50  ;;  %382 = vst.msk [vmem:[#allocation2 + $0x14] sm:$0x1] (!%p2546_p13), %vm294_vm0, %v3094_v50 }
  0x2d   : > { %380 = vst.msk [vmem:[#allocation2 + $0xc] sm:$0xf] (!%p2546_p13), %vm375_vm5, %v3094_v50  ;;  %381 = vst.msk [vmem:[#allocation2 + $0x10] sm:$0xf] (!%p2546_p13), %vm375_vm5, %v3094_v50 }
  0x30 PF: > { %p2547_p0 = scmp.ne.s32.totalorder %s3076_s27, 1 }
  0x31   : > { %vm388_vm6 = vcmask (!%p2547_p0), 781312   ;;  %v3095_v51 = vmov (!%p2547_p0), 0  }
  0x32   : > { %386 = sbr.rel (%p2547_p0) target bundleno = 57 (0x39), region = 56  ;;  %389 = vst.msk [vmem:[#allocation2 + $0x78] sm:$0xf] (!%p2547_p0), %vm388_vm6, %v3095_v51  ;;  %390 = vst.msk [vmem:[#allocation2 + $0x7c] sm:$0xf] (!%p2547_p0), %vm388_vm6, %v3095_v51 }
  0x33   : > { %392 = vst.msk [vmem:[#allocation2 + $0x80] sm:$0x1] (!%p2547_p0), %vm294_vm0, %v3095_v51  ;;  %395 = vst.msk [vmem:[#allocation2 + $0x8c] sm:$0x1] (!%p2547_p0), %vm294_vm0, %v3095_v51 }
  0x34   : > { %393 = vst.msk [vmem:[#allocation2 + $0x84] sm:$0xf] (!%p2547_p0), %vm388_vm6, %v3095_v51  ;;  %394 = vst.msk [vmem:[#allocation2 + $0x88] sm:$0xf] (!%p2547_p0), %vm388_vm6, %v3095_v51 }
  0x39 PF: > { %v2980_v52 = vld [vmem:[%s4052_s1] sm:$0xff]   ;;  %s2548_s23 = sadd.s32 4294967295, %s4060_s22  ;;  %vm491_vm7 = vcmask 130048   ;;  %v2992_v1 = vld [vmem:[%s4056_s5 + $0x8] sm:$0xff]   ;;  %v2993_v2 = vld [vmem:[%s4056_s5 + $0x10] sm:$0xff]   ;;  %s4069_s0 = sshll.u32 %s3076_s27, 3 }
  0x3a   : > { %p397_p1 = scmp.gt.s32.totalorder %s2548_s23, 0  ;;  %p2549_p2 = scmp.lt.s32.totalorder %s2548_s23, 6  ;;  %2855 = vmatprep.subr.bf16.mxu0 %v2980_v52  ;;  %v2991_v63 = vld [vmem:[%s4056_s5] sm:$0xff]   ;;  %v2994_v3 = vld [vmem:[%s4056_s5 + $0x18] sm:$0xff]   ;;  %v2996_v5 = vld [vmem:[%s4056_s5 + $0x28] sm:$0xff]   ;;  %vm940_vm8 = vcmask 781312  }
  0x3b   : > { %2856 = vmatpush3.bf16.msra.mxu0 %v2980_v52  ;;  %2877 = vmatprep.subr.bf16.mxu1 %v2991_v63  ;;  %v2995_v4 = vld [vmem:[%s4056_s5 + $0x20] sm:$0xff]   ;;  %vm735_vm9 = vsmask.f32 4368  ;;  %vm3348_vm10 = vmand %vm940_vm8, %vm333_vm3  ;;  %vm1153_vm12 = vcmask 1046528   ;;  %vm1294_vm13 = vcmask 1045504   ;;  %vm2183_vm14 = vcmask 785408  }
  0x3c   : > { %s4089_s23 = smov (!%p397_p1, %s2548_s23), 0  ;;  %2878 = vmatpush3.bf16.msra.mxu1 %v2991_v63  ;;  %v3332_v6 = vld [vmem:[%s4053_s2] ss:$0 sm:$0xff]  ;;  %vm3358_vm11 = vmor %vm295_vm1, %vm735_vm9  ;;  %s2714_s21 = sshll.u32 %s3076_s27, 6  ;;  %vm2420_vm15 = vcmask 125952  }
  0x3d   : > { %s4091_s23 = smov (!%p2549_p2, %s4089_s23), 6  ;;  %2879 = vmatprep.subr.bf16.mxu1 %v2992_v1  ;;  %s3096_s22 = smov [#allocation3]  }
  0x3e   : > { %s2692_s9 = sshll.u32 %s4091_s23, 3 }
  0x3f   : > { %s405_s10 = scalar_lea.vmem %s3241_s16, %s2692_s9  ;;  %s3924_s9 = scalar_lea.vmem %s3241_s16, %s2714_s21 }
  0x40   : > { %v2981_v53 = vld [vmem:[%s405_s10] sm:$0xff]   ;;  %v2982_v54 = vld [vmem:[%s405_s10 + $0x8] sm:$0xff]   ;;  %v2983_v55 = vld [vmem:[%s405_s10 + $0x10] sm:$0xff]   ;;  %2880 = vmatpush3.bf16.msra.mxu1 %v2992_v1  ;;  %s2731_s16 = sshll.u32 %s3076_s27, 4  ;;  %s2454_s27 = sshll.u32 %s3284_s17, 4  ;;  %s3984_s27 = int_to_ptr.vmem [resolvable:$true] %s2454_s27 }
  0x41   : > { %2857 = vmatprep.mubr.msk.bf16.mxu0 %vm491_vm7, %v2981_v53  ;;  %v2984_v56 = vld [vmem:[%s405_s10 + $0x18] sm:$0xff]   ;;  %v2985_v57 = vld [vmem:[%s405_s10 + $0x20] sm:$0xff]   ;;  %v2986_v58 = vld [vmem:[%s405_s10 + $0x28] sm:$0xff]   ;;  %2881 = vmatprep.subr.bf16.mxu1 %v2993_v2  ;;  %s4074_s21 = sand.u32 1, %s3068_s25   ;;  %s2998_s20 = scalar_lea.vmem %s3984_s27, 1024 }
  0x42   : > { %2858 = vmatmul.mubr.msk.bf16.vlgmr.msra.gmra.mrb[0].mxu0 %vm491_vm7, %v2982_v54  ;;  %v2987_v59 = vld [vmem:[%s405_s10 + $0x30] sm:$0xff]   ;;  %v2988_v60 = vld [vmem:[%s405_s10 + $0x38] sm:$0xff]   ;;  %v2989_v61 = vld [vmem:[%s405_s10 + $0x40] sm:$0xff]   ;;  %p2999_p4 = scmp.ne.s32.totalorder %s3984_s27, %s2998_s20 }
  0x43   : > { %2861 = vmatprep.mubr.msk.bf16.mxu0 %vm491_vm7, %v2983_v55  ;;  %v2990_v62 = vld [vmem:[%s405_s10 + $0x48] sm:$0xff]   ;;  %s3338_s10 = ssub.s32 %s4091_s23, %s4069_s0  ;;  %s2685_s0 = sshll.u32 %s3080_s28, 5 }
  0x44   : > { %2882 = vmatpush3.bf16.msra.mxu1 %v2993_v2  ;;  %s2489_s13 = smul.u32 12, %s3338_s10  ;;  %v1015_v54 = vld [vmem:[%s4054_s3 + $0x8] sm:$0x7]  ;;  %s2451_s10 = sadd.s32 %s2731_s16, %s2685_s0 }
  0x45   : > { %2883 = vmatprep.subr.bf16.mxu1 %v2994_v3  ;;  %s2686_s28 = sshll.u32 %s2451_s10, 6  ;;  %p3000_p5 = pnand %p2999_p4, %p3190_p3 }
  0x46   : > { %s3352_s23 = scalar_lea.vmem [#allocation2], %s2489_s13  ;;  %s3991_s18 = scalar_lea.hbm %s4058_s7, %s2686_s28 }
  0x47   : > { %v2603_v42 = vld [vmem:[%s3352_s23 + $0x24] sm:$0xf]  ;;  %v2598_v49 = vld [vmem:[%s3352_s23 + $0x18] sm:$0xf]  ;;  %v2606_v55 = vld [vmem:[%s3352_s23 + $0x2c] sm:$0x1]  ;;  %p3001_p6 = pneg %p3000_p5 }
  0x48   : > { %2884 = vmatpush3.bf16.msra.mxu1 %v2994_v3  ;;  %s3002_s16 = sshll.u32 %s3096_s22, 4  ;;  %s3003_s16 = int_to_ptr.vmem [resolvable:$false] %s3002_s16 }
  0x49   : > { %2885 = vmatprep.subr.bf16.mxu1 %v2995_v4  ;;  %s3004_s0 = scalar_lea.vmem %s3003_s16, 2048  ;;  %p3005_p7 = scmp.lt.s32.totalorder %s3984_s27, %s3003_s16 }
  0x4a   : > { %2862 = vmatmul.mubr.msk.bf16.gmra.mrb[4].mxu0 %vm491_vm7, %v2984_v56  ;;  %p3006_p9 = scmp.lt.s32.totalorder %s3004_s0, %s2998_s20 }
  0x4b   : > { %2865 = vmatprep.mubr.msk.bf16.mxu0 %vm491_vm7, %v2985_v57 }
  0x4c   : > { %2886 = vmatpush3.bf16.msra.mxu1 %v2995_v4  ;;  %p3007_p10 = por %p3006_p9, %p3005_p7 }
  0x4d   : > { %2887 = vmatprep.subr.bf16.mxu1 %v2996_v5 }
  0x4e   : > { %p3008_p11 = pnand %p3007_p10, %p3001_p6 }
  0x50   : > { %2888 = vmatpush3.bf16.msra.mxu1 %v2996_v5 }
  0x52   : > { %2866 = vmatmul.mubr.msk.bf16.gmra.mrb[8].mxu0 %vm491_vm7, %v2986_v58 }
  0x53   : > { %2869 = vmatprep.mubr.msk.bf16.mxu0 %vm491_vm7, %v2987_v59 }
  0x5a   : > { %2870 = vmatmul.mubr.msk.bf16.gmra.mrb[12].mxu0 %vm491_vm7, %v2988_v60 }
  0x5b   : > { %2873 = vmatprep.mubr.msk.bf16.mxu0 %vm491_vm7, %v2989_v61  ;;  %v2601_v61 = vld [vmem:[%s3352_s23 + $0x20] sm:$0x1] }
  0x62   : > { %2874 = vmatmul.mubr.msk.bf16.gmra.mrb[16].mxu0 %vm491_vm7, %v2990_v62 }
 0x115   : > { %v2859_v7 = vpop.f32.mrb[0].mxu0 }
 0x116   : > { %v565_v8 = vadd.f32 %v2859_v7, %v3332_v6  ;;  %v556_v9 = vpop.f32.mrb[1].mxu0 }
 0x117   : > { %v557_v10 = vadd.f32 %v3332_v6, %v556_v9  ;;  %v2860_v11 = vpop.f32.mrb[2].mxu0 }
 0x118   : > { %v637_v12 = vmax.f32 %v565_v8, 0.0  ;;  %v568_v13 = vadd.f32 %v2860_v11, %v3332_v6  ;;  %v559_v14 = vpop.f32.mrb[3].mxu0 }
 0x119   : > { %v635_v15 = vmax.f32 %v557_v10, 0.0  ;;  %v560_v16 = vadd.f32 %v3332_v6, %v559_v14 }
 0x11a   : > { %v657_v17 = vmin.f32 %v637_v12, 6.0  ;;  %v638_v18 = vmax.f32 %v568_v13, 0.0 }
 0x11b   : > { %v655_v19 = vmin.f32 %v635_v15, 6.0  ;;  %v636_v20 = vmax.f32 %v560_v16, 0.0 }
 0x11c   : > { %v2695_v21 = vpack.c.bf16 %v657_v17, %v657_v17  ;;  %v658_v22 = vmin.f32 %v638_v18, 6.0 }
 0x11d   : > { %v2693_v23 = vpack.c.bf16 %v655_v19, %v655_v19  ;;  %v656_v24 = vmin.f32 %v636_v20, 6.0  ;;  %v2863_v25 = vpop.f32.mrb[4].mxu0 }
 0x11e   : > { %v755_v26 = vshrl.u32 %v2695_v21, 16  ;;  %v758_v27 = vshll.u32 %v2695_v21, 16  ;;  %v2696_v28 = vpack.c.bf16 %v658_v22, %v658_v22  ;;  %v581_v29 = vadd.f32 %v2863_v25, %v3332_v6  ;;  %v572_v30 = vpop.f32.mrb[5].mxu0  ;;  %v2613_v21 = vld [vmem:[%s3352_s23 + $0x3c] sm:$0xf] }
 0x11f   : > { %v738_v31 = vshrl.u32 %v2693_v23, 16  ;;  %v741_v32 = vshll.u32 %v2693_v23, 16  ;;  %v2694_v33 = vpack.c.bf16 %v656_v24, %v656_v24  ;;  %v573_v34 = vadd.f32 %v3332_v6, %v572_v30  ;;  %v2864_v35 = vpop.f32.mrb[6].mxu0 }
 0x120   : > { %v757_v36 = vrot.slane %v755_v26, 7  ;;  %v763_v37 = vshrl.u32 %v2696_v28, 16  ;;  %v766_v38 = vshll.u32 %v2696_v28, 16  ;;  %v641_v39 = vmax.f32 %v581_v29, 0.0  ;;  %v575_v40 = vpop.f32.mrb[7].mxu0 }
 0x121   : > { %v740_v43 = vrot.slane %v738_v31, 7  ;;  %v746_v44 = vshrl.u32 %v2694_v33, 16  ;;  %v749_v45 = vshll.u32 %v2694_v33, 16  ;;  %v639_v46 = vmax.f32 %v573_v34, 0.0  ;;  %v2608_v28 = vld [vmem:[%s3352_s23 + $0x30] sm:$0xf] }
 0x122   : > { %v760_v47 = vor.u32 %v758_v27, %v757_v36  ;;  %v761_v48 = vrot.slane %v757_v36, 4  ;;  %v765_v50 = vrot.slane %v763_v37, 7  ;;  %v661_v51 = vmin.f32 %v641_v39, 6.0 }
 0x123   : > { %v743_v52 = vor.u32 %v741_v32, %v740_v43  ;;  %v744_v53 = vrot.slane %v740_v43, 4  ;;  %v748_v56 = vrot.slane %v746_v44, 7  ;;  %v659_v57 = vmin.f32 %v639_v46, 6.0 }
 0x124   : > { %v951_v58 = vsel %vm3348_vm10, %v760_v47, %v2603_v42  ;;  %v768_v59 = vor.u32 %v766_v38, %v765_v50  ;;  %v770_v60 = vrot.slane %v765_v50, 4  ;;  %v2699_v62 = vpack.c.bf16 %v661_v51, %v661_v51 }
 0x125   : > { %2604 = vst [vmem:[%s3352_s23 + $0x24] sm:$0xf] %v951_v58  ;;  %v943_v63 = vsel %vm3348_vm10, %v743_v52, %v2598_v49  ;;  %v751_v1 = vor.u32 %v749_v45, %v748_v56  ;;  %v753_v2 = vrot.slane %v748_v56, 4  ;;  %v2697_v3 = vpack.c.bf16 %v659_v57, %v659_v57  ;;  %v2867_v4 = vpop.f32.mrb[8].mxu0 }
 0x126   : > { %2599 = vst [vmem:[%s3352_s23 + $0x18] sm:$0xf] %v943_v63  ;;  %v769_v5 = vsel %vm3358_vm11, %v761_v48, %v768_v59  ;;  %v955_v7 = vsel %vm3219_vm2, %v770_v60, %v2606_v55  ;;  %v789_v8 = vshrl.u32 %v2699_v62, 16  ;;  %v792_v9 = vshll.u32 %v2699_v62, 16  ;;  %v588_v10 = vpop.f32.mrb[9].mxu0 }
 0x127   : > { %2605 = vst.msk [vmem:[%s3352_s23 + $0x28] sm:$0xf] %vm940_vm8, %v769_v5  ;;  %2607 = vst [vmem:[%s3352_s23 + $0x2c] sm:$0x1] %v955_v7  ;;  %v752_v11 = vsel %vm3358_vm11, %v744_v53, %v751_v1  ;;  %v948_v12 = vsel %vm3219_vm2, %v753_v2, %v2601_v61  ;;  %v772_v13 = vshrl.u32 %v2697_v3, 16  ;;  %v775_v14 = vshll.u32 %v2697_v3, 16 }
 0x128   : > { %v2868_v15 = vpop.f32.mrb[10].mxu0  ;;  %2600 = vst.msk [vmem:[%s3352_s23 + $0x1c] sm:$0xf] %vm940_vm8, %v752_v11  ;;  %2602 = vst [vmem:[%s3352_s23 + $0x20] sm:$0x1] %v948_v12  ;;  %v3384_v16 = vrot.slane %v789_v8, 7  ;;  %v584_v17 = vadd.f32 %v2864_v35, %v3332_v6  ;;  %v576_v18 = vadd.f32 %v3332_v6, %v575_v40  ;;  %v597_v19 = vadd.f32 %v2867_v4, %v3332_v6 }
 0x129   : > { %v591_v20 = vpop.f32.mrb[11].mxu0  ;;  %v3390_v22 = vrot.slane %v772_v13, 7  ;;  %v589_v23 = vadd.f32 %v3332_v6, %v588_v10  ;;  %v600_v24 = vadd.f32 %v2868_v15, %v3332_v6  ;;  %v2616_v3 = vld [vmem:[%s3352_s23 + $0x44] sm:$0x1]  ;;  %v2611_v8 = vld [vmem:[%s3352_s23 + $0x38] sm:$0x1] }
 0x12a   : > { %v592_v25 = vadd.f32 %v3332_v6, %v591_v20  ;;  %v794_v26 = vor.u32 %v792_v9, %v3384_v16  ;;  %v795_v27 = vrot.slane %v3384_v16, 4  ;;  %v642_v29 = vmax.f32 %v584_v17, 0.0  ;;  %v2623_v17 = vld [vmem:[%s3352_s23 + $0x54] sm:$0xf] }
 0x12b   : > { %v640_v30 = vmax.f32 %v576_v18, 0.0  ;;  %v777_v31 = vor.u32 %v775_v14, %v3390_v22  ;;  %v778_v32 = vrot.slane %v3390_v22, 4  ;;  %v645_v33 = vmax.f32 %v597_v19, 0.0  ;;  %v2618_v18 = vld [vmem:[%s3352_s23 + $0x48] sm:$0xf] }
 0x12c   : > { %v643_v34 = vmax.f32 %v589_v23, 0.0  ;;  %v965_v35 = vsel %vm3348_vm10, %v794_v26, %v2613_v21  ;;  %v662_v36 = vmin.f32 %v642_v29, 6.0  ;;  %v646_v38 = vmax.f32 %v600_v24, 0.0 }
 0x12d   : > { %v660_v37 = vmin.f32 %v640_v30, 6.0  ;;  %2614 = vst [vmem:[%s3352_s23 + $0x3c] sm:$0xf] %v965_v35  ;;  %v958_v39 = vsel %vm3348_vm10, %v777_v31, %v2608_v28  ;;  %v665_v40 = vmin.f32 %v645_v33, 6.0  ;;  %v644_v43 = vmax.f32 %v592_v25, 0.0  ;;  %v2871_v44 = vpop.f32.mrb[12].mxu0 }
 0x12e   : > { %v663_v42 = vmin.f32 %v643_v34, 6.0  ;;  %2609 = vst [vmem:[%s3352_s23 + $0x30] sm:$0xf] %v958_v39  ;;  %v2700_v45 = vpack.c.bf16 %v662_v36, %v662_v36  ;;  %v666_v47 = vmin.f32 %v646_v38, 6.0  ;;  %v613_v48 = vadd.f32 %v2871_v44, %v3332_v6  ;;  %v604_v49 = vpop.f32.mrb[13].mxu0 }
 0x12f   : > { %v2698_v46 = vpack.c.bf16 %v660_v37, %v660_v37  ;;  %v2703_v50 = vpack.c.bf16 %v665_v40, %v665_v40  ;;  %v664_v52 = vmin.f32 %v644_v43, 6.0  ;;  %v605_v53 = vadd.f32 %v3332_v6, %v604_v49  ;;  %v2872_v55 = vpop.f32.mrb[14].mxu0  ;;  %v2626_v44 = vld [vmem:[%s3352_s23 + $0x5c] sm:$0x1] }
 0x130   : > { %v2701_v51 = vpack.c.bf16 %v663_v42, %v663_v42  ;;  %v797_v56 = vshrl.u32 %v2700_v45, 16  ;;  %v800_v57 = vshll.u32 %v2700_v45, 16  ;;  %v607_v60 = vpop.f32.mrb[15].mxu0  ;;  %v2704_v5 = vpack.c.bf16 %v666_v47, %v666_v47 }
 0x131   : > { %v780_v58 = vshrl.u32 %v2698_v46, 16  ;;  %v783_v59 = vshll.u32 %v2698_v46, 16  ;;  %v823_v61 = vshrl.u32 %v2703_v50, 16  ;;  %v826_v62 = vshll.u32 %v2703_v50, 16 }
 0x132   : > { %v806_v63 = vshrl.u32 %v2701_v51, 16  ;;  %v809_v1 = vshll.u32 %v2701_v51, 16  ;;  %v799_v2 = vrot.slane %v797_v56, 7  ;;  %v2702_v7 = vpack.c.bf16 %v664_v52, %v664_v52  ;;  %v2621_v51 = vld [vmem:[%s3352_s23 + $0x50] sm:$0x1] }
 0x133   : > { %v782_v4 = vrot.slane %v780_v58, 7  ;;  %v825_v9 = vrot.slane %v823_v61, 7  ;;  %v649_v11 = vmax.f32 %v613_v48, 0.0  ;;  %v647_v12 = vmax.f32 %v605_v53, 0.0 }
 0x134   : > { %v808_v10 = vrot.slane %v806_v63, 7  ;;  %v802_v13 = vor.u32 %v800_v57, %v799_v2  ;;  %v804_v14 = vrot.slane %v799_v2, 4  ;;  %v831_v31 = vshrl.u32 %v2704_v5, 16 }
 0x135   : > { %v785_v15 = vor.u32 %v783_v59, %v782_v4  ;;  %v787_v16 = vrot.slane %v782_v4, 4  ;;  %v828_v19 = vor.u32 %v826_v62, %v825_v9  ;;  %v829_v20 = vrot.slane %v825_v9, 4  ;;  %v2875_v23 = vpop.f32.mrb[16].mxu0  ;;  %v2633_v4 = vld [vmem:[%s3352_s23 + $0x6c] sm:$0xf] }
 0x136   : > { %v811_v21 = vor.u32 %v809_v1, %v808_v10  ;;  %v812_v22 = vrot.slane %v808_v10, 4  ;;  %v803_v24 = vsel %vm3358_vm11, %v795_v27, %v802_v13  ;;  %v969_v25 = vsel %vm3219_vm2, %v804_v14, %v2616_v3  ;;  %v620_v29 = vpop.f32.mrb[17].mxu0 }
 0x137   : > { %v786_v26 = vsel %vm3358_vm11, %v778_v32, %v785_v15  ;;  %v962_v28 = vsel %vm3219_vm2, %v787_v16, %v2611_v8  ;;  %2615 = vst.msk [vmem:[%s3352_s23 + $0x40] sm:$0xf] %vm940_vm8, %v803_v24  ;;  %2617 = vst [vmem:[%s3352_s23 + $0x44] sm:$0x1] %v969_v25  ;;  %v979_v30 = vsel %vm3348_vm10, %v828_v19, %v2623_v17  ;;  %v834_v33 = vshll.u32 %v2704_v5, 16  ;;  %v2876_v32 = vpop.f32.mrb[18].mxu0 }
 0x138   : > { %2610 = vst.msk [vmem:[%s3352_s23 + $0x34] sm:$0xf] %vm940_vm8, %v786_v26  ;;  %2612 = vst [vmem:[%s3352_s23 + $0x38] sm:$0x1] %v962_v28  ;;  %v972_v27 = vsel %vm3348_vm10, %v811_v21, %v2618_v18  ;;  %v814_v34 = vshrl.u32 %v2702_v7, 16  ;;  %v817_v35 = vshll.u32 %v2702_v7, 16  ;;  %v616_v40 = vadd.f32 %v2872_v55, %v3332_v6 }
 0x139   : > { %2624 = vst [vmem:[%s3352_s23 + $0x54] sm:$0xf] %v979_v30  ;;  %2619 = vst [vmem:[%s3352_s23 + $0x48] sm:$0xf] %v972_v27  ;;  %v669_v36 = vmin.f32 %v649_v11, 6.0  ;;  %v667_v37 = vmin.f32 %v647_v12, 6.0  ;;  %v608_v42 = vadd.f32 %v3332_v6, %v607_v60  ;;  %v629_v43 = vadd.f32 %v2875_v23, %v3332_v6 }
 0x13a   : > { %v623_v38 = vpop.f32.mrb[19].mxu0  ;;  %v833_v39 = vrot.slane %v831_v31, 7  ;;  %v816_v45 = vrot.slane %v814_v34, 7  ;;  %v621_v48 = vadd.f32 %v3332_v6, %v620_v29  ;;  %v650_v52 = vmax.f32 %v616_v40, 0.0  ;;  %v2628_v11 = vld [vmem:[%s3352_s23 + $0x60] sm:$0xf] }
 0x13b   : > { %v2707_v46 = vpack.c.bf16 %v669_v36, %v669_v36  ;;  %v2705_v47 = vpack.c.bf16 %v667_v37, %v667_v37  ;;  %v648_v53 = vmax.f32 %v608_v42, 0.0  ;;  %v653_v8 = vmax.f32 %v629_v43, 0.0  ;;  %v2636_v27 = vld [vmem:[%s3352_s23 + $0x74] sm:$0x1]  ;;  %v2631_v37 = vld [vmem:[%s3352_s23 + $0x68] sm:$0x1] }
 0x13c   : > { %v836_v49 = vor.u32 %v834_v33, %v833_v39  ;;  %v838_v50 = vrot.slane %v833_v39, 4  ;;  %v819_v55 = vor.u32 %v817_v35, %v816_v45  ;;  %v821_v56 = vrot.slane %v816_v45, 4 }
 0x13d   : > { %v857_v57 = vshrl.u32 %v2707_v46, 16  ;;  %v860_v58 = vshll.u32 %v2707_v46, 16  ;;  %v840_v61 = vshrl.u32 %v2705_v47, 16  ;;  %v843_v62 = vshll.u32 %v2705_v47, 16  ;;  %v2643_v46 = vld [vmem:[%s3352_s23 + $0x84] sm:$0xf] }
 0x13e   : > { %v837_v59 = vsel %vm3358_vm11, %v829_v20, %v836_v49  ;;  %v983_v60 = vsel %vm3219_vm2, %v838_v50, %v2626_v44  ;;  %v820_v63 = vsel %vm3358_vm11, %v812_v22, %v819_v55  ;;  %v976_v1 = vsel %vm3219_vm2, %v821_v56, %v2621_v51 }
 0x13f   : > { %2625 = vst.msk [vmem:[%s3352_s23 + $0x58] sm:$0xf] %vm940_vm8, %v837_v59  ;;  %2627 = vst [vmem:[%s3352_s23 + $0x5c] sm:$0x1] %v983_v60  ;;  %v859_v2 = vrot.slane %v857_v57, 7  ;;  %v670_v3 = vmin.f32 %v650_v52, 6.0  ;;  %v632_v13 = vadd.f32 %v2876_v32, %v3332_v6  ;;  %v624_v30 = vadd.f32 %v3332_v6, %v623_v38 }
 0x140   : > { %2620 = vst.msk [vmem:[%s3352_s23 + $0x4c] sm:$0xf] %vm940_vm8, %v820_v63  ;;  %2622 = vst [vmem:[%s3352_s23 + $0x50] sm:$0x1] %v976_v1  ;;  %v842_v5 = vrot.slane %v840_v61, 7  ;;  %v668_v7 = vmin.f32 %v648_v53, 6.0  ;;  %v1049_v61 = vlaneseq }
 0x141   : > { %v651_v9 = vmax.f32 %v621_v48, 0.0  ;;  %v862_v10 = vor.u32 %v860_v58, %v859_v2  ;;  %v2708_v12 = vpack.c.bf16 %v670_v3, %v670_v3  ;;  %v863_v14 = vrot.slane %v859_v2, 4  ;;  %v2638_v52 = vld [vmem:[%s3352_s23 + $0x78] sm:$0xf]  ;;  %v2646_v3 = vld [vmem:[%s3352_s23 + $0x8c] sm:$0x1] }
 0x142   : > { %v845_v15 = vor.u32 %v843_v62, %v842_v5  ;;  %v2706_v16 = vpack.c.bf16 %v668_v7, %v668_v7  ;;  %v673_v17 = vmin.f32 %v653_v8, 6.0  ;;  %v846_v19 = vrot.slane %v842_v5, 4 }
 0x143   : > { %v993_v18 = vsel %vm3348_vm10, %v862_v10, %v2633_v4  ;;  %v865_v20 = vshrl.u32 %v2708_v12, 16  ;;  %v671_v21 = vmin.f32 %v651_v9, 6.0  ;;  %v868_v23 = vshll.u32 %v2708_v12, 16  ;;  %v2641_v9 = vld [vmem:[%s3352_s23 + $0x80] sm:$0x1] }
 0x144   : > { %2634 = vst [vmem:[%s3352_s23 + $0x6c] sm:$0xf] %v993_v18  ;;  %v986_v22 = vsel %vm3348_vm10, %v845_v15, %v2628_v11  ;;  %v848_v24 = vshrl.u32 %v2706_v16, 16  ;;  %v2711_v25 = vpack.c.bf16 %v673_v17, %v673_v17  ;;  %v654_v29 = vmax.f32 %v632_v13, 0.0 }
 0x145   : > { %2629 = vst [vmem:[%s3352_s23 + $0x60] sm:$0xf] %v986_v22  ;;  %v867_v26 = vrot.slane %v865_v20, 7  ;;  %v2709_v28 = vpack.c.bf16 %v671_v21, %v671_v21  ;;  %v851_v33 = vshll.u32 %v2706_v16, 16  ;;  %v652_v48 = vmax.f32 %v624_v30, 0.0 }
 0x146   : > { %v850_v31 = vrot.slane %v848_v24, 7  ;;  %v891_v32 = vshrl.u32 %v2711_v25, 16  ;;  %v894_v34 = vshll.u32 %v2711_v25, 16  ;;  %v674_v6 = vmin.f32 %v654_v29, 6.0  ;;  %v1013_v20 = vld [vmem:[%s4054_s3] sm:$0x7] }
 0x147   : > { %v870_v35 = vor.u32 %v868_v23, %v867_v26  ;;  %v872_v36 = vrot.slane %v867_v26, 4  ;;  %v874_v39 = vshrl.u32 %v2709_v28, 16  ;;  %v877_v40 = vshll.u32 %v2709_v28, 16  ;;  %v1014_v21 = vld [vmem:[%s4054_s3 + $0x4] sm:$0x7] }
 0x148   : > { %v853_v42 = vor.u32 %v851_v33, %v850_v31  ;;  %v855_v43 = vrot.slane %v850_v31, 4  ;;  %v893_v44 = vrot.slane %v891_v32, 7  ;;  %v2712_v55 = vpack.c.bf16 %v674_v6, %v674_v6 }
 0x149   : > { %v871_v38 = vsel %vm3358_vm11, %v863_v14, %v870_v35  ;;  %v997_v45 = vsel %vm3219_vm2, %v872_v36, %v2636_v27  ;;  %v876_v47 = vrot.slane %v874_v39, 7  ;;  %v672_v56 = vmin.f32 %v652_v48, 6.0 }
 0x14a   : > { %2635 = vst.msk [vmem:[%s3352_s23 + $0x70] sm:$0xf] %vm940_vm8, %v871_v38  ;;  %2637 = vst [vmem:[%s3352_s23 + $0x74] sm:$0x1] %v997_v45  ;;  %v854_v49 = vsel %vm3358_vm11, %v846_v19, %v853_v42  ;;  %v990_v50 = vsel %vm3219_vm2, %v855_v43, %v2631_v37  ;;  %v896_v51 = vor.u32 %v894_v34, %v893_v44  ;;  %v899_v59 = vshrl.u32 %v2712_v55, 16 }
 0x14b   : > { %2630 = vst.msk [vmem:[%s3352_s23 + $0x64] sm:$0xf] %vm940_vm8, %v854_v49  ;;  %2632 = vst [vmem:[%s3352_s23 + $0x68] sm:$0x1] %v990_v50  ;;  %v879_v53 = vor.u32 %v877_v40, %v876_v47  ;;  %v2710_v60 = vpack.c.bf16 %v672_v56, %v672_v56  ;;  %v902_v63 = vshll.u32 %v2712_v55, 16  ;;  %v897_v2 = vrot.slane %v893_v44, 4 }
 0x14c   : > { %v1007_v57 = vsel %vm3348_vm10, %v896_v51, %v2643_v46  ;;  %v901_v62 = vrot.slane %v899_v59, 7  ;;  %v880_v41 = vrot.slane %v876_v47, 4  ;;  %v1050_v10 = vshrl.u32 %v1049_v61, 7 }
 0x14d   : > { %2644 = vst [vmem:[%s3352_s23 + $0x84] sm:$0xf] %v1007_v57  ;;  %v1000_v58 = vsel %vm3348_vm10, %v879_v53, %v2638_v52  ;;  %v882_v1 = vshrl.u32 %v2710_v60, 16  ;;  %v885_v8 = vshll.u32 %v2710_v60, 16 }
 0x14e   : > { %2639 = vst [vmem:[%s3352_s23 + $0x78] sm:$0xf] %v1000_v58  ;;  %v904_v4 = vor.u32 %v902_v63, %v901_v62  ;;  %v906_v5 = vrot.slane %v901_v62, 4  ;;  %v1051_v17 = vsub.s32 0, %v1050_v10  ;;  %v1103_v18 = vsub.s32 1, %v1050_v10 }
 0x14f   : > { %v884_v7 = vrot.slane %v882_v1, 7  ;;  %v1244_v19 = vsub.s32 2, %v1050_v10 }
 0x150   : > { %v905_v11 = vsel %vm3358_vm11, %v897_v2, %v904_v4  ;;  %v1011_v12 = vsel %vm3219_vm2, %v906_v5, %v2646_v3  ;;  %v3511_v0 = vrot.slane %v1013_v20, %v1051_v17  ;;  %v3513_v22 = vrot.slane %v1013_v20, %v1103_v18 }
 0x151   : > { %v887_v13 = vor.u32 %v885_v8, %v884_v7  ;;  %v889_v14 = vrot.slane %v884_v7, 4  ;;  %2645 = vst.msk [vmem:[%s3352_s23 + $0x88] sm:$0xf] %vm940_vm8, %v905_v11  ;;  %2647 = vst [vmem:[%s3352_s23 + $0x8c] sm:$0x1] %v1011_v12  ;;  %v3515_v23 = vrot.slane %v1013_v20, %v1244_v19  ;;  %v3517_v24 = vrot.slane %v1014_v21, %v1051_v17 }
 0x152   : > { %v3519_v25 = vrot.slane %v1014_v21, %v1103_v18  ;;  %v3521_v26 = vrot.slane %v1014_v21, %v1244_v19  ;;  %v3523_v27 = vrot.slane %v1015_v54, %v1051_v17  ;;  %v3525_v31 = vrot.slane %v1015_v54, %v1103_v18 }
 0x153   : > { %v888_v15 = vsel %vm3358_vm11, %v880_v41, %v887_v13  ;;  %v1004_v16 = vsel %vm3219_vm2, %v889_v14, %v2641_v9  ;;  %v3527_v33 = vrot.slane %v1015_v54, %v1244_v19 }
 0x154   : > { %2640 = vst.msk [vmem:[%s3352_s23 + $0x7c] sm:$0xf] %vm940_vm8, %v888_v15  ;;  %2642 = vst [vmem:[%s3352_s23 + $0x80] sm:$0x1] %v1004_v16 }
 0x15b   : > { %v1017_v28 = vld [vmem:[#allocation2 + $0xc] sm:$0xff]   ;;  %v1085_v29 = vld [vmem:[#allocation2 + $0x14] sm:$0x1]  ;;  %v2749_v37 = vld [vmem:[#allocation2 + $0x18] sm:$0xff]  }
 0x15c   : > { %v1226_v30 = vld [vmem:[#allocation2 + $0xc] sm:$0xe]  ;;  %v1033_v32 = vunpack.c.l.bf16 %v1017_v28  ;;  %v1034_v34 = vunpack.c.h.bf16 %v1017_v28  ;;  %v1093_v35 = vunpack.c.l.bf16 %v1085_v29  ;;  %v1436_v39 = vld [vmem:[#allocation2 + $0x20] sm:$0x1]  ;;  %v1576_v40 = vld [vmem:[#allocation2 + $0x18] sm:$0xe]  ;;  %v3529_v42 = vunpack.c.l.bf16 %v2749_v37 }
 0x15d   : > { %v1234_v36 = vunpack.c.l.bf16 %v1226_v30  ;;  %v3531_v43 = vunpack.c.h.bf16 %v2749_v37  ;;  %v1444_v44 = vunpack.c.l.bf16 %v1436_v39  ;;  %v1584_v6 = vunpack.c.l.bf16 %v1576_v40  ;;  %v1717_v7 = vld [vmem:[#allocation2 + $0x24] sm:$0xff]   ;;  %v1785_v15 = vld [vmem:[#allocation2 + $0x2c] sm:$0x1] }
 0x15e   : > { %v1053_v38 = vmul.f32 %v3511_v0, %v1033_v32  ;;  %v1054_v45 = vmul.f32 %v3511_v0, %v1034_v34  ;;  %v1105_v46 = vmul.f32 %v3513_v22, %v1033_v32  ;;  %v1106_v47 = vmul.f32 %v3513_v22, %v1034_v34 }
 0x15f   : > { %v1107_v48 = vmul.f32 %v3513_v22, %v1093_v35  ;;  %v1246_v49 = vmul.f32 %v3515_v23, %v1234_v36  ;;  %v1247_v50 = vmul.f32 %v3515_v23, %v1034_v34  ;;  %v1248_v51 = vmul.f32 %v3515_v23, %v1093_v35  ;;  %v1925_v35 = vld [vmem:[#allocation2 + $0x24] sm:$0xe] }
 0x160   : > { %v1154_v52 = vrot.slane %v1105_v46, 1  ;;  %v1155_v53 = vrot.slane %v1106_v47, 1  ;;  %v1404_v55 = vmul.f32 %v3529_v42, %v3517_v24  ;;  %v1405_v56 = vmul.f32 %v3531_v43, %v3517_v24 }
 0x161   : > { %v1157_v57 = vrot.slane %v1107_v48, 1  ;;  %v1295_v58 = vrot.slane %v1246_v49, 2  ;;  %v1296_v59 = vrot.slane %v1247_v50, 2  ;;  %v1298_v60 = vrot.slane %v1248_v51, 2 }
 0x162   : > { %v1156_v61 = vsel %vm1153_vm12, %v1154_v52, %v1155_v53  ;;  %v1456_v62 = vmul.f32 %v3529_v42, %v3519_v25  ;;  %v1457_v63 = vmul.f32 %v3531_v43, %v3519_v25  ;;  %v1458_v1 = vmul.f32 %v3519_v25, %v1444_v44 }
 0x163   : > { %v1158_v2 = vsel %vm1153_vm12, %v1155_v53, %v1157_v57  ;;  %v1210_v3 = vadd.f32 %v1156_v61, %v1053_v38  ;;  %v1297_v4 = vsel %vm1294_vm13, %v1295_v58, %v1296_v59  ;;  %v1299_v5 = vsel %vm1294_vm13, %v1296_v59, %v1298_v60 }
 0x164   : > { %v1211_v8 = vadd.f32 %v1158_v2, %v1054_v45  ;;  %v1504_v41 = vrot.slane %v1456_v62, 1  ;;  %v1505_v9 = vrot.slane %v1457_v63, 1  ;;  %v1507_v10 = vrot.slane %v1458_v1, 1  ;;  %v1227_v1 = vld [vmem:[#allocation2 + $0x18] sm:$0xe] }
 0x165   : > { %v1351_v11 = vadd.f32 %v1297_v4, %v1210_v3  ;;  %v1596_v12 = vmul.f32 %v3521_v26, %v1584_v6  ;;  %v1597_v13 = vmul.f32 %v3531_v43, %v3521_v26  ;;  %v1598_v14 = vmul.f32 %v3521_v26, %v1444_v44 }
 0x166   : > { %v1352_v16 = vadd.f32 %v1299_v5, %v1211_v8  ;;  %v1506_v17 = vsel %vm1153_vm12, %v1504_v41, %v1505_v9  ;;  %v1508_v18 = vsel %vm1153_vm12, %v1505_v9, %v1507_v10  ;;  %v1733_v19 = vunpack.c.l.bf16 %v1717_v7 }
 0x167   : > { %v1420_v20 = vadd.f32 %v1404_v55, %v1351_v11  ;;  %v1644_v21 = vrot.slane %v1596_v12, 2  ;;  %v1645_v54 = vrot.slane %v1597_v13, 2  ;;  %v1647_v28 = vrot.slane %v1598_v14, 2  ;;  %v1086_v55 = vld [vmem:[#allocation2 + $0x20] sm:$0x1] }
 0x168   : > { %v1421_v29 = vadd.f32 %v1405_v56, %v1352_v16  ;;  %v1734_v30 = vunpack.c.h.bf16 %v1717_v7  ;;  %v1753_v32 = vmul.f32 %v3523_v27, %v1733_v19  ;;  %v1793_v34 = vunpack.c.l.bf16 %v1785_v15  ;;  %v3585_v11 = vld [vmem:[%s4055_s4] ss:$0 sm:$0xff]  ;;  %v1370_v15 = vld [vmem:[#allocation2 + $0x24] sm:$0xff]  }
 0x169   : > { %v1560_v36 = vadd.f32 %v1506_v17, %v1420_v20  ;;  %v1646_v37 = vsel %vm1294_vm13, %v1644_v21, %v1645_v54  ;;  %v1648_v39 = vsel %vm1294_vm13, %v1645_v54, %v1647_v28  ;;  %v1805_v40 = vmul.f32 %v3525_v31, %v1733_v19 }
 0x16a   : > { %v1561_v44 = vadd.f32 %v1508_v18, %v1421_v29  ;;  %v1754_v6 = vmul.f32 %v3523_v27, %v1734_v30  ;;  %v1806_v38 = vmul.f32 %v3525_v31, %v1734_v30  ;;  %v1807_v45 = vmul.f32 %v3525_v31, %v1793_v34 }
 0x16b   : > { %v1700_v46 = vadd.f32 %v1646_v37, %v1560_v36  ;;  %v1853_v47 = vrot.slane %v1805_v40, 1  ;;  %v1933_v48 = vunpack.c.l.bf16 %v1925_v35  ;;  %v1946_v49 = vmul.f32 %v3527_v33, %v1734_v30 }
 0x16c   : > { %v1701_v50 = vadd.f32 %v1648_v39, %v1561_v44  ;;  %v1854_v51 = vrot.slane %v1806_v38, 1  ;;  %v1856_v52 = vrot.slane %v1807_v45, 1  ;;  %v1947_v53 = vmul.f32 %v3527_v33, %v1793_v34  ;;  %v1437_v34 = vld [vmem:[#allocation2 + $0x2c] sm:$0x1] }
 0x16d   : > { %v1769_v56 = vadd.f32 %v1753_v32, %v1700_v46  ;;  %v1945_v57 = vmul.f32 %v3527_v33, %v1933_v48  ;;  %v1994_v58 = vrot.slane %v1946_v49, 2  ;;  %v1055_v59 = vmul.f32 %v3529_v42, %v3511_v0  ;;  %v1577_v48 = vld [vmem:[#allocation2 + $0x24] sm:$0xe] }
 0x16e   : > { %v1770_v60 = vadd.f32 %v1754_v6, %v1701_v50  ;;  %v1855_v61 = vsel %vm1153_vm12, %v1853_v47, %v1854_v51  ;;  %v1857_v62 = vsel %vm1153_vm12, %v1854_v51, %v1856_v52  ;;  %v1996_v63 = vrot.slane %v1947_v53, 2 }
 0x16f   : > { %v1909_v2 = vadd.f32 %v1855_v61, %v1769_v56  ;;  %v1993_v3 = vrot.slane %v1945_v57, 2  ;;  %v1056_v4 = vmul.f32 %v3531_v43, %v3511_v0  ;;  %v1094_v5 = vunpack.c.l.bf16 %v1086_v55 }
 0x170   : > { %v1910_v7 = vadd.f32 %v1857_v62, %v1770_v60  ;;  %v1997_v8 = vsel %vm1294_vm13, %v1994_v58, %v1996_v63  ;;  %v1108_v41 = vmul.f32 %v3529_v42, %v3513_v22  ;;  %v1109_v9 = vmul.f32 %v3531_v43, %v3513_v22  ;;  %v1786_v63 = vld [vmem:[#allocation2 + $0x38] sm:$0x1] }
 0x171   : > { %v1995_v10 = vsel %vm1294_vm13, %v1993_v3, %v1994_v58  ;;  %v1110_v12 = vmul.f32 %v3513_v22, %v1094_v5  ;;  %v1235_v13 = vunpack.c.l.bf16 %v1227_v1  ;;  %v1250_v14 = vmul.f32 %v3531_v43, %v3515_v23  ;;  %v2819_v58 = vld [vmem:[#allocation2 + $0x30] sm:$0xff]  }
 0x172   : > { %v2049_v16 = vadd.f32 %v1995_v10, %v1909_v2  ;;  %v2050_v42 = vadd.f32 %v1997_v8, %v1910_v7  ;;  %v1159_v17 = vrot.slane %v1108_v41, 1  ;;  %v1160_v18 = vrot.slane %v1109_v9, 1 }
 0x173   : > { %v1162_v19 = vrot.slane %v1110_v12, 1  ;;  %v1249_v20 = vmul.f32 %v3515_v23, %v1235_v13  ;;  %v1251_v21 = vmul.f32 %v3515_v23, %v1094_v5  ;;  %v1301_v54 = vrot.slane %v1250_v14, 2  ;;  %v1926_v14 = vld [vmem:[#allocation2 + $0x30] sm:$0xe] }
 0x174   : > { %v2072_v28 = vadd.f32 %v3585_v11, %v2049_v16  ;;  %v2073_v29 = vadd.f32 %v3585_v11, %v2050_v42  ;;  %v1161_v30 = vsel %vm1153_vm12, %v1159_v17, %v1160_v18  ;;  %v1386_v32 = vunpack.c.l.bf16 %v1370_v15 }
 0x175   : > { %v1163_v43 = vsel %vm1153_vm12, %v1160_v18, %v1162_v19  ;;  %v1212_v35 = vadd.f32 %v1161_v30, %v1055_v59  ;;  %v1300_v36 = vrot.slane %v1249_v20, 2  ;;  %v1303_v37 = vrot.slane %v1251_v21, 2 }
 0x176   : > { %v2088_v39 = vmax.f32 %v2072_v28, 0.0  ;;  %v2089_v40 = vmax.f32 %v2073_v29, 0.0  ;;  %v1213_v44 = vadd.f32 %v1163_v43, %v1056_v4  ;;  %v1387_v6 = vunpack.c.h.bf16 %v1370_v15 }
 0x177   : > { %v1302_v38 = vsel %vm1294_vm13, %v1300_v36, %v1301_v54  ;;  %v1304_v45 = vsel %vm1294_vm13, %v1301_v54, %v1303_v37  ;;  %v1406_v46 = vmul.f32 %v3517_v24, %v1386_v32  ;;  %v1445_v47 = vunpack.c.l.bf16 %v1437_v34 }
 0x178   : > { %v2104_v49 = vmin.f32 %v2088_v39, 6.0  ;;  %v2105_v50 = vmin.f32 %v2089_v40, 6.0  ;;  %v1353_v51 = vadd.f32 %v1302_v38, %v1212_v35  ;;  %v1354_v52 = vadd.f32 %v1304_v45, %v1213_v44 }
 0x179   : > { %v1407_v53 = vmul.f32 %v3517_v24, %v1387_v6  ;;  %v1459_v55 = vmul.f32 %v3519_v25, %v1386_v32  ;;  %v1460_v56 = vmul.f32 %v3519_v25, %v1387_v6  ;;  %v1461_v57 = vmul.f32 %v3519_v25, %v1445_v47  ;;  %v1021_v32 = vld [vmem:[#allocation2 + $0x24] sm:$0xff]  }
 0x17a   : > { %v2120_v59 = vpack.c.bf16 %v2105_v50, %v2104_v49  ;;  %v1422_v60 = vadd.f32 %v1406_v46, %v1353_v51  ;;  %v1585_v61 = vunpack.c.l.bf16 %v1577_v48  ;;  %v1600_v62 = vmul.f32 %v3521_v26, %v1387_v6 }
 0x17b   : > { %v1423_v1 = vadd.f32 %v1407_v53, %v1354_v52  ;;  %v1509_v2 = vrot.slane %v1459_v55, 1  ;;  %v1510_v3 = vrot.slane %v1460_v56, 1  ;;  %v1512_v4 = vrot.slane %v1461_v57, 1  ;;  %v1228_v57 = vld [vmem:[#allocation2 + $0x24] sm:$0xe] }
 0x17c   : > { %2889 = vmatprep.mubr.msk.bf16.mxu1 %vm2183_vm14, %v2120_v59  ;;  %v1599_v5 = vmul.f32 %v3521_v26, %v1585_v61  ;;  %v1601_v7 = vmul.f32 %v3521_v26, %v1445_v47  ;;  %v1650_v8 = vrot.slane %v1600_v62, 2  ;;  %v3607_v41 = vunpack.c.l.bf16 %v2819_v58  ;;  %v1087_v47 = vld [vmem:[#allocation2 + $0x2c] sm:$0x1] }
 0x17d   : > { %v1511_v9 = vsel %vm1153_vm12, %v1509_v2, %v1510_v3  ;;  %v1513_v10 = vsel %vm1153_vm12, %v1510_v3, %v1512_v4  ;;  %v3611_v12 = vunpack.c.h.bf16 %v2819_v58  ;;  %v1794_v13 = vunpack.c.l.bf16 %v1786_v63 }
 0x17e   : > { %v1562_v15 = vadd.f32 %v1511_v9, %v1422_v60  ;;  %v1563_v16 = vadd.f32 %v1513_v10, %v1423_v1  ;;  %v1649_v42 = vrot.slane %v1599_v5, 2  ;;  %v1652_v17 = vrot.slane %v1601_v7, 2 }
 0x17f   : > { %v1755_v18 = vmul.f32 %v3607_v41, %v3523_v27  ;;  %v1756_v19 = vmul.f32 %v3611_v12, %v3523_v27  ;;  %v1808_v20 = vmul.f32 %v3607_v41, %v3525_v31  ;;  %v1809_v21 = vmul.f32 %v3611_v12, %v3525_v31 }
 0x180   : > { %v1651_v54 = vsel %vm1294_vm13, %v1649_v42, %v1650_v8  ;;  %v1653_v28 = vsel %vm1294_vm13, %v1650_v8, %v1652_v17  ;;  %v1810_v29 = vmul.f32 %v3525_v31, %v1794_v13  ;;  %v1934_v30 = vunpack.c.l.bf16 %v1926_v14 }
 0x181   : > { %v1702_v34 = vadd.f32 %v1651_v54, %v1562_v15  ;;  %v1703_v43 = vadd.f32 %v1653_v28, %v1563_v16  ;;  %v1858_v35 = vrot.slane %v1808_v20, 1  ;;  %v1859_v36 = vrot.slane %v1809_v21, 1  ;;  %v1438_v21 = vld [vmem:[#allocation2 + $0x38] sm:$0x1] }
 0x182   : > { %v1861_v37 = vrot.slane %v1810_v29, 1  ;;  %v1948_v39 = vmul.f32 %v3527_v33, %v1934_v30  ;;  %v1949_v40 = vmul.f32 %v3611_v12, %v3527_v33  ;;  %v1950_v44 = vmul.f32 %v3527_v33, %v1794_v13 }
 0x183   : > { %v1771_v6 = vadd.f32 %v1755_v18, %v1702_v34  ;;  %v1772_v38 = vadd.f32 %v1756_v19, %v1703_v43  ;;  %v1860_v45 = vsel %vm1153_vm12, %v1858_v35, %v1859_v36  ;;  %v1037_v46 = vunpack.c.l.bf16 %v1021_v32 }
 0x184   : > { %v1862_v48 = vsel %vm1153_vm12, %v1859_v36, %v1861_v37  ;;  %v1998_v49 = vrot.slane %v1948_v39, 2  ;;  %v1999_v50 = vrot.slane %v1949_v40, 2  ;;  %v2001_v51 = vrot.slane %v1950_v44, 2 }
 0x185   : > { %v1911_v52 = vadd.f32 %v1860_v45, %v1771_v6  ;;  %v1912_v53 = vadd.f32 %v1862_v48, %v1772_v38  ;;  %v1038_v55 = vunpack.c.h.bf16 %v1021_v32  ;;  %v1057_v56 = vmul.f32 %v3511_v0, %v1037_v46  ;;  %v1578_v32 = vld [vmem:[#allocation2 + $0x30] sm:$0xe] }
 0x186   : > { %v2000_v58 = vsel %vm1294_vm13, %v1998_v49, %v1999_v50  ;;  %v2002_v59 = vsel %vm1294_vm13, %v1999_v50, %v2001_v51  ;;  %v1095_v60 = vunpack.c.l.bf16 %v1087_v47  ;;  %v1111_v61 = vmul.f32 %v3513_v22, %v1037_v46  ;;  %v1721_v47 = vld [vmem:[#allocation2 + $0x3c] sm:$0xff]  }
 0x187   : > { %v2051_v62 = vadd.f32 %v2000_v58, %v1911_v52  ;;  %v2052_v63 = vadd.f32 %v2002_v59, %v1912_v53  ;;  %v1058_v1 = vmul.f32 %v3511_v0, %v1038_v55  ;;  %v1112_v2 = vmul.f32 %v3513_v22, %v1038_v55 }
 0x188   : > { %v1113_v3 = vmul.f32 %v3513_v22, %v1095_v60  ;;  %v1164_v4 = vrot.slane %v1111_v61, 1  ;;  %v1236_v5 = vunpack.c.l.bf16 %v1228_v57  ;;  %v1253_v7 = vmul.f32 %v3515_v23, %v1038_v55  ;;  %v1787_v57 = vld [vmem:[#allocation2 + $0x44] sm:$0x1] }
 0x189   : > { %v2074_v8 = vadd.f32 %v3585_v11, %v2051_v62  ;;  %v2075_v9 = vadd.f32 %v3585_v11, %v2052_v63  ;;  %v1165_v10 = vrot.slane %v1112_v2, 1  ;;  %v1254_v13 = vmul.f32 %v3515_v23, %v1095_v60 }
 0x18a   : > { %v1167_v14 = vrot.slane %v1113_v3, 1  ;;  %v1252_v15 = vmul.f32 %v3515_v23, %v1236_v5  ;;  %v1306_v16 = vrot.slane %v1253_v7, 2  ;;  %v1408_v42 = vmul.f32 %v3607_v41, %v3517_v24 }
 0x18b   : > { %v2090_v17 = vmax.f32 %v2074_v8, 0.0  ;;  %v2091_v18 = vmax.f32 %v2075_v9, 0.0  ;;  %v1166_v19 = vsel %vm1153_vm12, %v1164_v4, %v1165_v10  ;;  %v1308_v20 = vrot.slane %v1254_v13, 2  ;;  %v1927_v8 = vld [vmem:[#allocation2 + $0x3c] sm:$0xe] }
 0x18c   : > { %v1168_v54 = vsel %vm1153_vm12, %v1165_v10, %v1167_v14  ;;  %v1214_v28 = vadd.f32 %v1166_v19, %v1057_v56  ;;  %v1305_v29 = vrot.slane %v1252_v15, 2  ;;  %v1409_v30 = vmul.f32 %v3611_v12, %v3517_v24 }
 0x18d   : > { %v2106_v34 = vmin.f32 %v2090_v17, 6.0  ;;  %v2107_v43 = vmin.f32 %v2091_v18, 6.0  ;;  %v1215_v35 = vadd.f32 %v1168_v54, %v1058_v1  ;;  %v1309_v36 = vsel %vm1294_vm13, %v1306_v16, %v1308_v20  ;;  %v1088_v54 = vld [vmem:[#allocation2 + $0x38] sm:$0x1] }
 0x18e   : > { %v1307_v37 = vsel %vm1294_vm13, %v1305_v29, %v1306_v16  ;;  %v1446_v39 = vunpack.c.l.bf16 %v1438_v21  ;;  %v1462_v40 = vmul.f32 %v3607_v41, %v3519_v25  ;;  %v1463_v44 = vmul.f32 %v3611_v12, %v3519_v25 }
 0x18f   : > { %v2121_v6 = vpack.c.bf16 %v2107_v43, %v2106_v34  ;;  %v1355_v38 = vadd.f32 %v1307_v37, %v1214_v28  ;;  %v1356_v45 = vadd.f32 %v1309_v36, %v1215_v35  ;;  %v1586_v46 = vunpack.c.l.bf16 %v1578_v32  ;;  %v1229_v37 = vld [vmem:[#allocation2 + $0x30] sm:$0xe] }
 0x190   : > { %v1464_v48 = vmul.f32 %v3519_v25, %v1446_v39  ;;  %v1514_v49 = vrot.slane %v1462_v40, 1  ;;  %v1515_v50 = vrot.slane %v1463_v44, 1  ;;  %v1603_v51 = vmul.f32 %v3611_v12, %v3521_v26 }
 0x191   : > { %2890 = vmatmul.mubr.msk.bf16.vlgmr.msra.gmra.mrb[0].mxu1 %vm2183_vm14, %v2121_v6  ;;  %v1424_v52 = vadd.f32 %v1408_v42, %v1355_v38  ;;  %v1425_v53 = vadd.f32 %v1409_v30, %v1356_v45  ;;  %v1602_v55 = vmul.f32 %v3521_v26, %v1586_v46  ;;  %v1604_v56 = vmul.f32 %v3521_v26, %v1446_v39 }
 0x192   : > { %v1516_v58 = vsel %vm1153_vm12, %v1514_v49, %v1515_v50  ;;  %v1517_v59 = vrot.slane %v1464_v48, 1  ;;  %v1655_v60 = vrot.slane %v1603_v51, 2  ;;  %v1737_v61 = vunpack.c.l.bf16 %v1721_v47 }
 0x193   : > { %v1564_v62 = vadd.f32 %v1516_v58, %v1424_v52  ;;  %v1654_v63 = vrot.slane %v1602_v55, 2  ;;  %v1657_v1 = vrot.slane %v1604_v56, 2  ;;  %v1738_v2 = vunpack.c.h.bf16 %v1721_v47 }
 0x194   : > { %v1518_v3 = vsel %vm1153_vm12, %v1515_v50, %v1517_v59  ;;  %v1757_v4 = vmul.f32 %v3523_v27, %v1737_v61  ;;  %v1795_v5 = vunpack.c.l.bf16 %v1787_v57  ;;  %v1811_v7 = vmul.f32 %v3525_v31, %v1737_v61  ;;  %v1374_v57 = vld [vmem:[#allocation2 + $0x3c] sm:$0xff]  }
 0x195   : > { %v1565_v9 = vadd.f32 %v1518_v3, %v1425_v53  ;;  %v1656_v10 = vsel %vm1294_vm13, %v1654_v63, %v1655_v60  ;;  %v1658_v13 = vsel %vm1294_vm13, %v1655_v60, %v1657_v1  ;;  %v1758_v14 = vmul.f32 %v3523_v27, %v1738_v2 }
 0x196   : > { %v1704_v15 = vadd.f32 %v1656_v10, %v1564_v62  ;;  %v1812_v16 = vmul.f32 %v3525_v31, %v1738_v2  ;;  %v1813_v42 = vmul.f32 %v3525_v31, %v1795_v5  ;;  %v1863_v17 = vrot.slane %v1811_v7, 1 }
 0x197   : > { %v1705_v18 = vadd.f32 %v1658_v13, %v1565_v9  ;;  %v1935_v19 = vunpack.c.l.bf16 %v1927_v8  ;;  %v1952_v20 = vmul.f32 %v3527_v33, %v1738_v2  ;;  %v1953_v21 = vmul.f32 %v3527_v33, %v1795_v5  ;;  %v1439_v5 = vld [vmem:[#allocation2 + $0x44] sm:$0x1] }
 0x198   : > { %v1773_v28 = vadd.f32 %v1757_v4, %v1704_v15  ;;  %v1864_v29 = vrot.slane %v1812_v16, 1  ;;  %v1866_v30 = vrot.slane %v1813_v42, 1  ;;  %v1059_v32 = vmul.f32 %v3607_v41, %v3511_v0  ;;  %v1579_v42 = vld [vmem:[#allocation2 + $0x3c] sm:$0xe] }
 0x199   : > { %v1774_v34 = vadd.f32 %v1758_v14, %v1705_v18  ;;  %v1951_v43 = vmul.f32 %v3527_v33, %v1935_v19  ;;  %v2004_v35 = vrot.slane %v1952_v20, 2  ;;  %v2006_v36 = vrot.slane %v1953_v21, 2 }
 0x19a   : > { %v1865_v39 = vsel %vm1153_vm12, %v1863_v17, %v1864_v29  ;;  %v1867_v40 = vsel %vm1153_vm12, %v1864_v29, %v1866_v30  ;;  %v1060_v44 = vmul.f32 %v3611_v12, %v3511_v0  ;;  %v1096_v6 = vunpack.c.l.bf16 %v1088_v54 }
 0x19b   : > { %v1913_v38 = vadd.f32 %v1865_v39, %v1773_v28  ;;  %v1914_v45 = vadd.f32 %v1867_v40, %v1774_v34  ;;  %v2003_v46 = vrot.slane %v1951_v43, 2  ;;  %v2007_v47 = vsel %vm1294_vm13, %v2004_v35, %v2006_v36  ;;  %v1788_v36 = vld [vmem:[#allocation2 + $0x50] sm:$0x1] }
 0x19c   : > { %v1114_v48 = vmul.f32 %v3607_v41, %v3513_v22  ;;  %v1115_v49 = vmul.f32 %v3611_v12, %v3513_v22  ;;  %v1116_v50 = vmul.f32 %v3513_v22, %v1096_v6  ;;  %v1237_v51 = vunpack.c.l.bf16 %v1229_v37 }
 0x19d   : > { %v2005_v52 = vsel %vm1294_vm13, %v2003_v46, %v2004_v35  ;;  %v2054_v53 = vadd.f32 %v2007_v47, %v1914_v45  ;;  %v1256_v55 = vmul.f32 %v3611_v12, %v3515_v23  ;;  %v1257_v56 = vmul.f32 %v3515_v23, %v1096_v6  ;;  %v2820_v35 = vld [vmem:[#allocation2 + $0x48] sm:$0xff]  }
 0x19e   : > { %v2053_v58 = vadd.f32 %v2005_v52, %v1913_v38  ;;  %v1169_v59 = vrot.slane %v1114_v48, 1  ;;  %v1170_v60 = vrot.slane %v1115_v49, 1  ;;  %v1172_v61 = vrot.slane %v1116_v50, 1 }
 0x19f   : > { %v2077_v41 = vadd.f32 %v3585_v11, %v2054_v53  ;;  %v1255_v62 = vmul.f32 %v3515_v23, %v1237_v51  ;;  %v1311_v63 = vrot.slane %v1256_v55, 2  ;;  %v1313_v1 = vrot.slane %v1257_v56, 2  ;;  %v1928_v56 = vld [vmem:[#allocation2 + $0x48] sm:$0xe] }
 0x1a0   : > { %v2076_v2 = vadd.f32 %v3585_v11, %v2053_v58  ;;  %v1171_v3 = vsel %vm1153_vm12, %v1169_v59, %v1170_v60  ;;  %v1173_v4 = vsel %vm1153_vm12, %v1170_v60, %v1172_v61  ;;  %v1390_v12 = vunpack.c.l.bf16 %v1374_v57 }
 0x1a1   : > { %v2093_v7 = vmax.f32 %v2077_v41, 0.0  ;;  %v1216_v8 = vadd.f32 %v1171_v3, %v1059_v32  ;;  %v1217_v9 = vadd.f32 %v1173_v4, %v1060_v44  ;;  %v1310_v10 = vrot.slane %v1255_v62, 2 }
 0x1a2   : > { %v2092_v13 = vmax.f32 %v2076_v2, 0.0  ;;  %v1314_v14 = vsel %vm1294_vm13, %v1311_v63, %v1313_v1  ;;  %v1391_v15 = vunpack.c.h.bf16 %v1374_v57  ;;  %v1410_v16 = vmul.f32 %v3517_v24, %v1390_v12 }
 0x1a3   : > { %v2109_v17 = vmin.f32 %v2093_v7, 6.0  ;;  %v1312_v18 = vsel %vm1294_vm13, %v1310_v10, %v1311_v63  ;;  %v1358_v19 = vadd.f32 %v1314_v14, %v1217_v9  ;;  %v1447_v20 = vunpack.c.l.bf16 %v1439_v5 }
 0x1a4   : > { %v2108_v21 = vmin.f32 %v2092_v13, 6.0  ;;  %v1357_v54 = vadd.f32 %v1312_v18, %v1216_v8  ;;  %v1411_v28 = vmul.f32 %v3517_v24, %v1391_v15  ;;  %v1465_v29 = vmul.f32 %v3519_v25, %v1390_v12  ;;  %v1025_v12 = vld [vmem:[#allocation2 + $0x3c] sm:$0xff]  }
 0x1a5   : > { %v1466_v30 = vmul.f32 %v3519_v25, %v1391_v15  ;;  %v1467_v32 = vmul.f32 %v3519_v25, %v1447_v20  ;;  %v1587_v34 = vunpack.c.l.bf16 %v1579_v42  ;;  %v1606_v43 = vmul.f32 %v3521_v26, %v1391_v15 }
 0x1a6   : > { %v2122_v37 = vpack.c.bf16 %v2109_v17, %v2108_v21  ;;  %v1426_v39 = vadd.f32 %v1410_v16, %v1357_v54  ;;  %v1427_v40 = vadd.f32 %v1411_v28, %v1358_v19  ;;  %v1519_v44 = vrot.slane %v1465_v29, 1  ;;  %v1089_v16 = vld [vmem:[#allocation2 + $0x44] sm:$0x1]  ;;  %v1230_v29 = vld [vmem:[#allocation2 + $0x3c] sm:$0xe] }
 0x1a7   : > { %v1520_v6 = vrot.slane %v1466_v30, 1  ;;  %v1522_v38 = vrot.slane %v1467_v32, 1  ;;  %v1605_v45 = vmul.f32 %v3521_v26, %v1587_v34  ;;  %v1607_v46 = vmul.f32 %v3521_v26, %v1447_v20 }
 0x1a8   : > { %2893 = vmatprep.mubr.msk.bf16.mxu1 %vm2183_vm14, %v2122_v37  ;;  %v1660_v47 = vrot.slane %v1606_v43, 2  ;;  %v3704_v48 = vunpack.c.l.bf16 %v2820_v35  ;;  %v3706_v49 = vunpack.c.h.bf16 %v2820_v35  ;;  %v1796_v50 = vunpack.c.l.bf16 %v1788_v36 }
 0x1a9   : > { %v1521_v51 = vsel %vm1153_vm12, %v1519_v44, %v1520_v6  ;;  %v1523_v52 = vsel %vm1153_vm12, %v1520_v6, %v1522_v38  ;;  %v1659_v53 = vrot.slane %v1605_v45, 2  ;;  %v1662_v55 = vrot.slane %v1607_v46, 2 }
 0x1aa   : > { %v1566_v57 = vadd.f32 %v1521_v51, %v1426_v39  ;;  %v1567_v58 = vadd.f32 %v1523_v52, %v1427_v40  ;;  %v1759_v59 = vmul.f32 %v3704_v48, %v3523_v27  ;;  %v1760_v60 = vmul.f32 %v3706_v49, %v3523_v27 }
 0x1ab   : > { %v1661_v61 = vsel %vm1294_vm13, %v1659_v53, %v1660_v47  ;;  %v1663_v41 = vsel %vm1294_vm13, %v1660_v47, %v1662_v55  ;;  %v1814_v62 = vmul.f32 %v3704_v48, %v3525_v31  ;;  %v1815_v63 = vmul.f32 %v3706_v49, %v3525_v31 }
 0x1ac   : > { %v1706_v1 = vadd.f32 %v1661_v61, %v1566_v57  ;;  %v1707_v2 = vadd.f32 %v1663_v41, %v1567_v58  ;;  %v1816_v3 = vmul.f32 %v3525_v31, %v1796_v50  ;;  %v1936_v4 = vunpack.c.l.bf16 %v1928_v56 }
 0x1ad   : > { %v1868_v5 = vrot.slane %v1814_v62, 1  ;;  %v1869_v7 = vrot.slane %v1815_v63, 1  ;;  %v1955_v8 = vmul.f32 %v3706_v49, %v3527_v33  ;;  %v1956_v9 = vmul.f32 %v3527_v33, %v1796_v50 }
 0x1ae   : > { %v1775_v10 = vadd.f32 %v1759_v59, %v1706_v1  ;;  %v1776_v13 = vadd.f32 %v1760_v60, %v1707_v2  ;;  %v1871_v14 = vrot.slane %v1816_v3, 1  ;;  %v1954_v15 = vmul.f32 %v3527_v33, %v1936_v4  ;;  %v1440_v60 = vld [vmem:[#allocation2 + $0x50] sm:$0x1]  ;;  %v1580_v1 = vld [vmem:[#allocation2 + $0x48] sm:$0xe] }
 0x1af   : > { %v1870_v42 = vsel %vm1153_vm12, %v1868_v5, %v1869_v7  ;;  %v2009_v17 = vrot.slane %v1955_v8, 2  ;;  %v2011_v18 = vrot.slane %v1956_v9, 2  ;;  %v1041_v19 = vunpack.c.l.bf16 %v1025_v12 }
 0x1b0   : > { %v1872_v20 = vsel %vm1153_vm12, %v1869_v7, %v1871_v14  ;;  %v1915_v21 = vadd.f32 %v1870_v42, %v1775_v10  ;;  %v2008_v54 = vrot.slane %v1954_v15, 2  ;;  %v1042_v28 = vunpack.c.h.bf16 %v1025_v12 }
 0x1b1   : > { %v1916_v30 = vadd.f32 %v1872_v20, %v1776_v13  ;;  %v2012_v32 = vsel %vm1294_vm13, %v2009_v17, %v2011_v18  ;;  %v1061_v34 = vmul.f32 %v3511_v0, %v1041_v19  ;;  %v1097_v43 = vunpack.c.l.bf16 %v1089_v16  ;;  %v1725_v16 = vld [vmem:[#allocation2 + $0x54] sm:$0xff]  }
 0x1b2   : > { %v2010_v35 = vsel %vm1294_vm13, %v2008_v54, %v2009_v17  ;;  %v1062_v36 = vmul.f32 %v3511_v0, %v1042_v28  ;;  %v1117_v37 = vmul.f32 %v3513_v22, %v1041_v19  ;;  %v1118_v39 = vmul.f32 %v3513_v22, %v1042_v28 }
 0x1b3   : > { %v2055_v40 = vadd.f32 %v2010_v35, %v1915_v21  ;;  %v2056_v44 = vadd.f32 %v2012_v32, %v1916_v30  ;;  %v1119_v6 = vmul.f32 %v3513_v22, %v1097_v43  ;;  %v1238_v38 = vunpack.c.l.bf16 %v1230_v29 }
 0x1b4   : > { %v1174_v45 = vrot.slane %v1117_v37, 1  ;;  %v1175_v46 = vrot.slane %v1118_v39, 1  ;;  %v1259_v47 = vmul.f32 %v3515_v23, %v1042_v28  ;;  %v1260_v50 = vmul.f32 %v3515_v23, %v1097_v43  ;;  %v1789_v43 = vld [vmem:[#allocation2 + $0x5c] sm:$0x1] }
 0x1b5   : > { %v2078_v51 = vadd.f32 %v3585_v11, %v2055_v40  ;;  %v2079_v52 = vadd.f32 %v3585_v11, %v2056_v44  ;;  %v1177_v53 = vrot.slane %v1119_v6, 1  ;;  %v1258_v55 = vmul.f32 %v3515_v23, %v1238_v38 }
 0x1b6   : > { %v1176_v56 = vsel %vm1153_vm12, %v1174_v45, %v1175_v46  ;;  %v1316_v57 = vrot.slane %v1259_v47, 2  ;;  %v1318_v58 = vrot.slane %v1260_v50, 2  ;;  %v1412_v59 = vmul.f32 %v3704_v48, %v3517_v24  ;;  %v1929_v45 = vld [vmem:[#allocation2 + $0x54] sm:$0xe] }
 0x1b7   : > { %v2094_v61 = vmax.f32 %v2078_v51, 0.0  ;;  %v2095_v41 = vmax.f32 %v2079_v52, 0.0  ;;  %v1178_v62 = vsel %vm1153_vm12, %v1175_v46, %v1177_v53  ;;  %v1218_v63 = vadd.f32 %v1176_v56, %v1061_v34 }
 0x1b8   : > { %v1219_v2 = vadd.f32 %v1178_v62, %v1062_v36  ;;  %v1315_v3 = vrot.slane %v1258_v55, 2  ;;  %v1319_v4 = vsel %vm1294_vm13, %v1316_v57, %v1318_v58  ;;  %v1413_v12 = vmul.f32 %v3706_v49, %v3517_v24 }
 0x1b9   : > { %v2110_v5 = vmin.f32 %v2094_v61, 6.0  ;;  %v2111_v7 = vmin.f32 %v2095_v41, 6.0  ;;  %v1448_v8 = vunpack.c.l.bf16 %v1440_v60  ;;  %v1468_v9 = vmul.f32 %v3704_v48, %v3519_v25 }
 0x1ba   : > { %v1317_v10 = vsel %vm1294_vm13, %v1315_v3, %v1316_v57  ;;  %v1360_v13 = vadd.f32 %v1319_v4, %v1219_v2  ;;  %v1469_v14 = vmul.f32 %v3706_v49, %v3519_v25  ;;  %v1588_v15 = vunpack.c.l.bf16 %v1580_v1  ;;  %v1090_v1 = vld [vmem:[#allocation2 + $0x50] sm:$0x1] }
 0x1bb   : > { %v2123_v42 = vpack.c.bf16 %v2111_v7, %v2110_v5  ;;  %v1359_v17 = vadd.f32 %v1317_v10, %v1218_v63  ;;  %v1470_v18 = vmul.f32 %v3519_v25, %v1448_v8  ;;  %v1524_v19 = vrot.slane %v1468_v9, 1  ;;  %v1231_v10 = vld [vmem:[#allocation2 + $0x48] sm:$0xe] }
 0x1bc   : > { %v1429_v20 = vadd.f32 %v1413_v12, %v1360_v13  ;;  %v1525_v21 = vrot.slane %v1469_v14, 1  ;;  %v1608_v54 = vmul.f32 %v3521_v26, %v1588_v15  ;;  %v1609_v28 = vmul.f32 %v3706_v49, %v3521_v26 }
 0x1bd   : > { %2894 = vmatmul.mubr.msk.bf16.gmra.mrb[4].mxu1 %vm2183_vm14, %v2123_v42  ;;  %v1428_v29 = vadd.f32 %v1412_v59, %v1359_v17  ;;  %v1527_v30 = vrot.slane %v1470_v18, 1  ;;  %v1610_v32 = vmul.f32 %v3521_v26, %v1448_v8  ;;  %v1741_v34 = vunpack.c.l.bf16 %v1725_v16 }
 0x1be   : > { %v1526_v35 = vsel %vm1153_vm12, %v1524_v19, %v1525_v21  ;;  %v1664_v36 = vrot.slane %v1608_v54, 2  ;;  %v1665_v37 = vrot.slane %v1609_v28, 2  ;;  %v1742_v39 = vunpack.c.h.bf16 %v1725_v16 }
 0x1bf   : > { %v1528_v40 = vsel %vm1153_vm12, %v1525_v21, %v1527_v30  ;;  %v1568_v44 = vadd.f32 %v1526_v35, %v1428_v29  ;;  %v1667_v6 = vrot.slane %v1610_v32, 2  ;;  %v1761_v38 = vmul.f32 %v3523_v27, %v1741_v34  ;;  %v1378_v29 = vld [vmem:[#allocation2 + $0x54] sm:$0xff]  }
 0x1c0   : > { %v1569_v46 = vadd.f32 %v1528_v40, %v1429_v20  ;;  %v1666_v47 = vsel %vm1294_vm13, %v1664_v36, %v1665_v37  ;;  %v1762_v50 = vmul.f32 %v3523_v27, %v1742_v39  ;;  %v1797_v51 = vunpack.c.l.bf16 %v1789_v43 }
 0x1c1   : > { %v1668_v52 = vsel %vm1294_vm13, %v1665_v37, %v1667_v6  ;;  %v1708_v53 = vadd.f32 %v1666_v47, %v1568_v44  ;;  %v1817_v55 = vmul.f32 %v3525_v31, %v1741_v34  ;;  %v1818_v56 = vmul.f32 %v3525_v31, %v1742_v39 }
 0x1c2   : > { %v1709_v57 = vadd.f32 %v1668_v52, %v1569_v46  ;;  %v1819_v58 = vmul.f32 %v3525_v31, %v1797_v51  ;;  %v1937_v59 = vunpack.c.l.bf16 %v1929_v45  ;;  %v1958_v60 = vmul.f32 %v3527_v33, %v1742_v39 }
 0x1c3   : > { %v1777_v61 = vadd.f32 %v1761_v38, %v1708_v53  ;;  %v1873_v41 = vrot.slane %v1817_v55, 1  ;;  %v1874_v62 = vrot.slane %v1818_v56, 1  ;;  %v1959_v63 = vmul.f32 %v3527_v33, %v1797_v51  ;;  %v1441_v38 = vld [vmem:[#allocation2 + $0x5c] sm:$0x1] }
 0x1c4   : > { %v1778_v2 = vadd.f32 %v1762_v50, %v1709_v57  ;;  %v1876_v3 = vrot.slane %v1819_v58, 1  ;;  %v1957_v4 = vmul.f32 %v3527_v33, %v1937_v59  ;;  %v2014_v12 = vrot.slane %v1958_v60, 2  ;;  %v1581_v59 = vld [vmem:[#allocation2 + $0x54] sm:$0xe] }
 0x1c5   : > { %v1875_v5 = vsel %vm1153_vm12, %v1873_v41, %v1874_v62  ;;  %v2016_v7 = vrot.slane %v1959_v63, 2  ;;  %v1063_v8 = vmul.f32 %v3704_v48, %v3511_v0  ;;  %v1064_v9 = vmul.f32 %v3706_v49, %v3511_v0 }
 0x1c6   : > { %v1877_v13 = vsel %vm1153_vm12, %v1874_v62, %v1876_v3  ;;  %v1917_v14 = vadd.f32 %v1875_v5, %v1777_v61  ;;  %v2013_v15 = vrot.slane %v1957_v4, 2  ;;  %v1098_v16 = vunpack.c.l.bf16 %v1090_v1  ;;  %v2821_v4 = vld [vmem:[#allocation2 + $0x60] sm:$0xff]  }
 0x1c7   : > { %v1918_v42 = vadd.f32 %v1877_v13, %v1778_v2  ;;  %v2017_v17 = vsel %vm1294_vm13, %v2014_v12, %v2016_v7  ;;  %v1120_v18 = vmul.f32 %v3704_v48, %v3513_v22  ;;  %v1121_v19 = vmul.f32 %v3706_v49, %v3513_v22 }
 0x1c8   : > { %v2015_v20 = vsel %vm1294_vm13, %v2013_v15, %v2014_v12  ;;  %v1122_v21 = vmul.f32 %v3513_v22, %v1098_v16  ;;  %v1239_v54 = vunpack.c.l.bf16 %v1231_v10  ;;  %v1262_v28 = vmul.f32 %v3706_v49, %v3515_v23 }
 0x1c9   : > { %v2057_v30 = vadd.f32 %v2015_v20, %v1917_v14  ;;  %v2058_v32 = vadd.f32 %v2017_v17, %v1918_v42  ;;  %v1179_v34 = vrot.slane %v1120_v18, 1  ;;  %v1180_v43 = vrot.slane %v1121_v19, 1 }
 0x1ca   : > { %v1182_v35 = vrot.slane %v1122_v21, 1  ;;  %v1261_v36 = vmul.f32 %v3515_v23, %v1239_v54  ;;  %v1263_v48 = vmul.f32 %v3515_v23, %v1098_v16  ;;  %v1321_v37 = vrot.slane %v1262_v28, 2  ;;  %v1930_v28 = vld [vmem:[#allocation2 + $0x60] sm:$0xe] }
 0x1cb   : > { %v2080_v39 = vadd.f32 %v3585_v11, %v2057_v30  ;;  %v2081_v40 = vadd.f32 %v3585_v11, %v2058_v32  ;;  %v1181_v44 = vsel %vm1153_vm12, %v1179_v34, %v1180_v43  ;;  %v1394_v6 = vunpack.c.l.bf16 %v1378_v29 }
 0x1cc   : > { %v1183_v49 = vsel %vm1153_vm12, %v1180_v43, %v1182_v35  ;;  %v1220_v45 = vadd.f32 %v1181_v44, %v1063_v8  ;;  %v1320_v46 = vrot.slane %v1261_v36, 2  ;;  %v1323_v47 = vrot.slane %v1263_v48, 2 }
 0x1cd   : > { %v2096_v50 = vmax.f32 %v2080_v39, 0.0  ;;  %v2097_v51 = vmax.f32 %v2081_v40, 0.0  ;;  %v1221_v52 = vadd.f32 %v1183_v49, %v1064_v9  ;;  %v1395_v53 = vunpack.c.h.bf16 %v1378_v29  ;;  %v1790_v9 = vld [vmem:[#allocation2 + $0x68] sm:$0x1] }
 0x1ce   : > { %v1322_v55 = vsel %vm1294_vm13, %v1320_v46, %v1321_v37  ;;  %v1324_v56 = vsel %vm1294_vm13, %v1321_v37, %v1323_v47  ;;  %v1414_v57 = vmul.f32 %v3517_v24, %v1394_v6  ;;  %v1449_v58 = vunpack.c.l.bf16 %v1441_v38 }
 0x1cf   : > { %v2112_v60 = vmin.f32 %v2096_v50, 6.0  ;;  %v2113_v61 = vmin.f32 %v2097_v51, 6.0  ;;  %v1361_v41 = vadd.f32 %v1322_v55, %v1220_v45  ;;  %v1362_v62 = vadd.f32 %v1324_v56, %v1221_v52 }
 0x1d0   : > { %v1415_v63 = vmul.f32 %v3517_v24, %v1395_v53  ;;  %v1471_v1 = vmul.f32 %v3519_v25, %v1394_v6  ;;  %v1472_v2 = vmul.f32 %v3519_v25, %v1395_v53  ;;  %v1473_v3 = vmul.f32 %v3519_v25, %v1449_v58  ;;  %v1029_v6 = vld [vmem:[#allocation2 + $0x54] sm:$0xff]  }
 0x1d1   : > { %v2124_v12 = vpack.c.bf16 %v2113_v61, %v2112_v60  ;;  %v1430_v5 = vadd.f32 %v1414_v57, %v1361_v41  ;;  %v1589_v7 = vunpack.c.l.bf16 %v1581_v59  ;;  %v1612_v8 = vmul.f32 %v3521_v26, %v1395_v53 }
 0x1d2   : > { %v1431_v10 = vadd.f32 %v1415_v63, %v1362_v62  ;;  %v1529_v13 = vrot.slane %v1471_v1, 1  ;;  %v1530_v14 = vrot.slane %v1472_v2, 1  ;;  %v1532_v15 = vrot.slane %v1473_v3, 1  ;;  %v1232_v3 = vld [vmem:[#allocation2 + $0x54] sm:$0xe] }
 0x1d3   : > { %2897 = vmatprep.mubr.msk.bf16.mxu1 %vm2183_vm14, %v2124_v12  ;;  %v1611_v16 = vmul.f32 %v3521_v26, %v1589_v7  ;;  %v1613_v42 = vmul.f32 %v3521_v26, %v1449_v58  ;;  %v1670_v17 = vrot.slane %v1612_v8, 2  ;;  %v3801_v18 = vunpack.c.l.bf16 %v2821_v4  ;;  %v1091_v58 = vld [vmem:[#allocation2 + $0x5c] sm:$0x1] }
 0x1d4   : > { %v1531_v19 = vsel %vm1153_vm12, %v1529_v13, %v1530_v14  ;;  %v1533_v20 = vsel %vm1153_vm12, %v1530_v14, %v1532_v15  ;;  %v3805_v21 = vunpack.c.h.bf16 %v2821_v4  ;;  %v1798_v54 = vunpack.c.l.bf16 %v1790_v9 }
 0x1d5   : > { %v1570_v29 = vadd.f32 %v1531_v19, %v1430_v5  ;;  %v1571_v30 = vadd.f32 %v1533_v20, %v1431_v10  ;;  %v1669_v32 = vrot.slane %v1611_v16, 2  ;;  %v1672_v34 = vrot.slane %v1613_v42, 2 }
 0x1d6   : > { %v1763_v43 = vmul.f32 %v3801_v18, %v3523_v27  ;;  %v1764_v35 = vmul.f32 %v3805_v21, %v3523_v27  ;;  %v1820_v36 = vmul.f32 %v3801_v18, %v3525_v31  ;;  %v1821_v48 = vmul.f32 %v3805_v21, %v3525_v31 }
 0x1d7   : > { %v1671_v37 = vsel %vm1294_vm13, %v1669_v32, %v1670_v17  ;;  %v1673_v39 = vsel %vm1294_vm13, %v1670_v17, %v1672_v34  ;;  %v1822_v40 = vmul.f32 %v3525_v31, %v1798_v54  ;;  %v1938_v44 = vunpack.c.l.bf16 %v1930_v28 }
 0x1d8   : > { %v1710_v38 = vadd.f32 %v1671_v37, %v1570_v29  ;;  %v1711_v49 = vadd.f32 %v1673_v39, %v1571_v30  ;;  %v1878_v45 = vrot.slane %v1820_v36, 1  ;;  %v1879_v46 = vrot.slane %v1821_v48, 1  ;;  %v1442_v48 = vld [vmem:[#allocation2 + $0x68] sm:$0x1] }
 0x1d9   : > { %v1881_v47 = vrot.slane %v1822_v40, 1  ;;  %v1960_v50 = vmul.f32 %v3527_v33, %v1938_v44  ;;  %v1961_v51 = vmul.f32 %v3805_v21, %v3527_v33  ;;  %v1962_v52 = vmul.f32 %v3527_v33, %v1798_v54  ;;  %v1582_v44 = vld [vmem:[#allocation2 + $0x60] sm:$0xe] }
 0x1da   : > { %v1779_v53 = vadd.f32 %v1763_v43, %v1710_v38  ;;  %v1780_v55 = vadd.f32 %v1764_v35, %v1711_v49  ;;  %v1880_v56 = vsel %vm1153_vm12, %v1878_v45, %v1879_v46  ;;  %v1045_v57 = vunpack.c.l.bf16 %v1029_v6 }
 0x1db   : > { %v1882_v59 = vsel %vm1153_vm12, %v1879_v46, %v1881_v47  ;;  %v2018_v60 = vrot.slane %v1960_v50, 2  ;;  %v2019_v61 = vrot.slane %v1961_v51, 2  ;;  %v2021_v41 = vrot.slane %v1962_v52, 2 }
 0x1dc   : > { %v1919_v62 = vadd.f32 %v1880_v56, %v1779_v53  ;;  %v1920_v63 = vadd.f32 %v1882_v59, %v1780_v55  ;;  %v1046_v1 = vunpack.c.h.bf16 %v1029_v6  ;;  %v1065_v2 = vmul.f32 %v3511_v0, %v1045_v57 }
 0x1dd   : > { %v2020_v4 = vsel %vm1294_vm13, %v2018_v60, %v2019_v61  ;;  %v2022_v12 = vsel %vm1294_vm13, %v2019_v61, %v2021_v41  ;;  %v1099_v5 = vunpack.c.l.bf16 %v1091_v58  ;;  %v1123_v7 = vmul.f32 %v3513_v22, %v1045_v57  ;;  %v1729_v57 = vld [vmem:[#allocation2 + $0x6c] sm:$0xff]  }
 0x1de   : > { %v2059_v8 = vadd.f32 %v2020_v4, %v1919_v62  ;;  %v2060_v9 = vadd.f32 %v2022_v12, %v1920_v63  ;;  %v1066_v10 = vmul.f32 %v3511_v0, %v1046_v1  ;;  %v1124_v13 = vmul.f32 %v3513_v22, %v1046_v1 }
 0x1df   : > { %v1125_v14 = vmul.f32 %v3513_v22, %v1099_v5  ;;  %v1184_v15 = vrot.slane %v1123_v7, 1  ;;  %v1240_v16 = vunpack.c.l.bf16 %v1232_v3  ;;  %v1265_v42 = vmul.f32 %v3515_v23, %v1046_v1 }
 0x1e0   : > { %v2082_v17 = vadd.f32 %v3585_v11, %v2059_v8  ;;  %v2083_v19 = vadd.f32 %v3585_v11, %v2060_v9  ;;  %v1185_v20 = vrot.slane %v1124_v13, 1  ;;  %v1266_v54 = vmul.f32 %v3515_v23, %v1099_v5 }
 0x1e1   : > { %v1187_v28 = vrot.slane %v1125_v14, 1  ;;  %v1264_v29 = vmul.f32 %v3515_v23, %v1240_v16  ;;  %v1326_v30 = vrot.slane %v1265_v42, 2  ;;  %v1416_v32 = vmul.f32 %v3801_v18, %v3517_v24  ;;  %v1931_v42 = vld [vmem:[#allocation2 + $0x6c] sm:$0xe] }
 0x1e2   : > { %v2098_v34 = vmax.f32 %v2082_v17, 0.0  ;;  %v2099_v43 = vmax.f32 %v2083_v19, 0.0  ;;  %v1186_v35 = vsel %vm1153_vm12, %v1184_v15, %v1185_v20  ;;  %v1328_v36 = vrot.slane %v1266_v54, 2 }
 0x1e3   : > { %v1188_v37 = vsel %vm1153_vm12, %v1185_v20, %v1187_v28  ;;  %v1222_v39 = vadd.f32 %v1186_v35, %v1065_v2  ;;  %v1325_v11 = vrot.slane %v1264_v29, 2  ;;  %v1417_v40 = vmul.f32 %v3805_v21, %v3517_v24  ;;  %v1791_v2 = vld [vmem:[#allocation2 + $0x74] sm:$0x1] }
 0x1e4   : > { %v2114_v6 = vmin.f32 %v2098_v34, 6.0  ;;  %v2115_v38 = vmin.f32 %v2099_v43, 6.0  ;;  %v1223_v49 = vadd.f32 %v1188_v37, %v1066_v10  ;;  %v1329_v45 = vsel %vm1294_vm13, %v1326_v30, %v1328_v36 }
 0x1e5   : > { %v1327_v46 = vsel %vm1294_vm13, %v1325_v11, %v1326_v30  ;;  %v1450_v47 = vunpack.c.l.bf16 %v1442_v48  ;;  %v1474_v50 = vmul.f32 %v3801_v18, %v3519_v25  ;;  %v1475_v51 = vmul.f32 %v3805_v21, %v3519_v25  ;;  %v1092_v48 = vld [vmem:[#allocation2 + $0x68] sm:$0x1] }
 0x1e6   : > { %v2125_v52 = vpack.c.bf16 %v2115_v38, %v2114_v6  ;;  %v1363_v53 = vadd.f32 %v1327_v46, %v1222_v39  ;;  %v1364_v55 = vadd.f32 %v1329_v45, %v1223_v49  ;;  %v1590_v56 = vunpack.c.l.bf16 %v1582_v44  ;;  %v1233_v45 = vld [vmem:[#allocation2 + $0x60] sm:$0xe] }
 0x1e7   : > { %v1476_v58 = vmul.f32 %v3519_v25, %v1450_v47  ;;  %v1534_v59 = vrot.slane %v1474_v50, 1  ;;  %v1535_v60 = vrot.slane %v1475_v51, 1  ;;  %v1615_v61 = vmul.f32 %v3805_v21, %v3521_v26 }
 0x1e8   : > { %2898 = vmatmul.mubr.msk.bf16.gmra.mrb[8].mxu1 %vm2183_vm14, %v2125_v52  ;;  %v1432_v41 = vadd.f32 %v1416_v32, %v1363_v53  ;;  %v1433_v62 = vadd.f32 %v1417_v40, %v1364_v55  ;;  %v1614_v63 = vmul.f32 %v3521_v26, %v1590_v56  ;;  %v1616_v1 = vmul.f32 %v3521_v26, %v1450_v47 }
 0x1e9   : > { %v1536_v3 = vsel %vm1153_vm12, %v1534_v59, %v1535_v60  ;;  %v1537_v4 = vrot.slane %v1476_v58, 1  ;;  %v1675_v12 = vrot.slane %v1615_v61, 2  ;;  %v1745_v5 = vunpack.c.l.bf16 %v1729_v57 }
 0x1ea   : > { %v1572_v7 = vadd.f32 %v1536_v3, %v1432_v41  ;;  %v1674_v8 = vrot.slane %v1614_v63, 2  ;;  %v1677_v9 = vrot.slane %v1616_v1, 2  ;;  %v1746_v10 = vunpack.c.h.bf16 %v1729_v57  ;;  %v1382_v63 = vld [vmem:[#allocation2 + $0x6c] sm:$0xff]  }
 0x1eb   : > { %v1538_v13 = vsel %vm1153_vm12, %v1535_v60, %v1537_v4  ;;  %v1765_v14 = vmul.f32 %v3523_v27, %v1745_v5  ;;  %v1799_v15 = vunpack.c.l.bf16 %v1791_v2  ;;  %v1823_v16 = vmul.f32 %v3525_v31, %v1745_v5 }
 0x1ec   : > { %v1573_v17 = vadd.f32 %v1538_v13, %v1433_v62  ;;  %v1676_v19 = vsel %vm1294_vm13, %v1674_v8, %v1675_v12  ;;  %v1678_v20 = vsel %vm1294_vm13, %v1675_v12, %v1677_v9  ;;  %v1766_v54 = vmul.f32 %v3523_v27, %v1746_v10  ;;  %v1443_v13 = vld [vmem:[#allocation2 + $0x74] sm:$0x1] }
 0x1ed   : > { %v1712_v28 = vadd.f32 %v1676_v19, %v1572_v7  ;;  %v1824_v29 = vmul.f32 %v3525_v31, %v1746_v10  ;;  %v1825_v30 = vmul.f32 %v3525_v31, %v1799_v15  ;;  %v1883_v32 = vrot.slane %v1823_v16, 1 }
 0x1ee   : > { %v1713_v34 = vadd.f32 %v1678_v20, %v1573_v17  ;;  %v1939_v43 = vunpack.c.l.bf16 %v1931_v42  ;;  %v1964_v35 = vmul.f32 %v3527_v33, %v1746_v10  ;;  %v1965_v36 = vmul.f32 %v3527_v33, %v1799_v15 }
 0x1ef   : > { %v1781_v37 = vadd.f32 %v1765_v14, %v1712_v28  ;;  %v1884_v39 = vrot.slane %v1824_v29, 1  ;;  %v1886_v11 = vrot.slane %v1825_v30, 1  ;;  %v1067_v40 = vmul.f32 %v3801_v18, %v3511_v0 }
 0x1f0   : > { %v1782_v44 = vadd.f32 %v1766_v54, %v1713_v34  ;;  %v1963_v6 = vmul.f32 %v3527_v33, %v1939_v43  ;;  %v2024_v38 = vrot.slane %v1964_v35, 2  ;;  %v2026_v49 = vrot.slane %v1965_v36, 2  ;;  %v1583_v54 = vld [vmem:[#allocation2 + $0x6c] sm:$0xe] }
 0x1f1   : > { %v1885_v46 = vsel %vm1153_vm12, %v1883_v32, %v1884_v39  ;;  %v1887_v47 = vsel %vm1153_vm12, %v1884_v39, %v1886_v11  ;;  %v1068_v50 = vmul.f32 %v3805_v21, %v3511_v0  ;;  %v1100_v51 = vunpack.c.l.bf16 %v1092_v48 }
 0x1f2   : > { %v1921_v52 = vadd.f32 %v1885_v46, %v1781_v37  ;;  %v1922_v53 = vadd.f32 %v1887_v47, %v1782_v44  ;;  %v2023_v55 = vrot.slane %v1963_v6, 2  ;;  %v2027_v56 = vsel %vm1294_vm13, %v2024_v38, %v2026_v49  ;;  %v1792_v44 = vld [vmem:[#allocation2 + $0x80] sm:$0x1] }
 0x1f3   : > { %v1126_v57 = vmul.f32 %v3801_v18, %v3513_v22  ;;  %v1127_v58 = vmul.f32 %v3805_v21, %v3513_v22  ;;  %v1128_v59 = vmul.f32 %v3513_v22, %v1100_v51  ;;  %v1241_v60 = vunpack.c.l.bf16 %v1233_v45  ;;  %v3885_v18 = vld [vmem:[%s4055_s4] ss:$0 sm:$0xff] }
 0x1f4   : > { %v2025_v61 = vsel %vm1294_vm13, %v2023_v55, %v2024_v38  ;;  %v2062_v41 = vadd.f32 %v2027_v56, %v1922_v53  ;;  %v1268_v0 = vmul.f32 %v3805_v21, %v3515_v23  ;;  %v1269_v62 = vmul.f32 %v3515_v23, %v1100_v51 }
 0x1f5   : > { %v2061_v1 = vadd.f32 %v2025_v61, %v1921_v52  ;;  %v1189_v2 = vrot.slane %v1126_v57, 1  ;;  %v1190_v3 = vrot.slane %v1127_v58, 1  ;;  %v1192_v4 = vrot.slane %v1128_v59, 1  ;;  %v1932_v59 = vld [vmem:[#allocation2 + $0x78] sm:$0xe] }
 0x1f6   : > { %v2085_v22 = vadd.f32 %v3885_v18, %v2062_v41  ;;  %v1267_v12 = vmul.f32 %v3515_v23, %v1241_v60  ;;  %v1331_v5 = vrot.slane %v1268_v0, 2  ;;  %v1333_v7 = vrot.slane %v1269_v62, 2 }
 0x1f7   : > { %v2084_v21 = vadd.f32 %v3885_v18, %v2061_v1  ;;  %v1191_v8 = vsel %vm1153_vm12, %v1189_v2, %v1190_v3  ;;  %v1193_v9 = vsel %vm1153_vm12, %v1190_v3, %v1192_v4  ;;  %v1398_v10 = vunpack.c.l.bf16 %v1382_v63 }
 0x1f8   : > { %v2101_v14 = vmax.f32 %v2085_v22, 0.0  ;;  %v1224_v15 = vadd.f32 %v1191_v8, %v1067_v40  ;;  %v1225_v16 = vadd.f32 %v1193_v9, %v1068_v50  ;;  %v1330_v42 = vrot.slane %v1267_v12, 2  ;;  %v2822_v40 = vld [vmem:[#allocation2 + $0x78] sm:$0xff]  }
 0x1f9   : > { %v2100_v17 = vmax.f32 %v2084_v21, 0.0  ;;  %v1334_v19 = vsel %vm1294_vm13, %v1331_v5, %v1333_v7  ;;  %v1399_v20 = vunpack.c.h.bf16 %v1382_v63  ;;  %v1418_v23 = vmul.f32 %v3517_v24, %v1398_v10 }
 0x1fa   : > { %v2117_v28 = vmin.f32 %v2101_v14, 6.0  ;;  %v1332_v29 = vsel %vm1294_vm13, %v1330_v42, %v1331_v5  ;;  %v1366_v30 = vadd.f32 %v1334_v19, %v1225_v16  ;;  %v1451_v32 = vunpack.c.l.bf16 %v1443_v13 }
 0x1fb   : > { %v2116_v34 = vmin.f32 %v2100_v17, 6.0  ;;  %v1365_v43 = vadd.f32 %v1332_v29, %v1224_v15  ;;  %v1419_v35 = vmul.f32 %v3517_v24, %v1399_v20  ;;  %v1477_v36 = vmul.f32 %v3519_v25, %v1398_v10 }
 0x1fc   : > { %v1478_v48 = vmul.f32 %v3519_v25, %v1399_v20  ;;  %v1479_v37 = vmul.f32 %v3519_v25, %v1451_v32  ;;  %v1591_v39 = vunpack.c.l.bf16 %v1583_v54  ;;  %v1618_v11 = vmul.f32 %v3521_v26, %v1399_v20 }
 0x1fd   : > { %v2126_v6 = vpack.c.bf16 %v2117_v28, %v2116_v34  ;;  %v1434_v38 = vadd.f32 %v1418_v23, %v1365_v43  ;;  %v1435_v49 = vadd.f32 %v1419_v35, %v1366_v30  ;;  %v1539_v45 = vrot.slane %v1477_v36, 1  ;;  %v2823_v35 = vld [vmem:[%s3924_s9 + $0x8] sm:$0xff]   ;;  %v2781_v36 = vld [vmem:[%s3924_s9] sm:$0xff]  }
 0x1fe   : > { %v1540_v46 = vrot.slane %v1478_v48, 1  ;;  %v1542_v47 = vrot.slane %v1479_v37, 1  ;;  %v1617_v50 = vmul.f32 %v3521_v26, %v1591_v39  ;;  %v1619_v24 = vmul.f32 %v3521_v26, %v1451_v32  ;;  %v3931_v48 = vld [vmem:[%s4057_s6] ss:$0 sm:$0xff] }
 0x1ff   : > { %2901 = vmatprep.mubr.msk.bf16.mxu1 %vm2183_vm14, %v2126_v6  ;;  %v1680_v51 = vrot.slane %v1618_v11, 2  ;;  %v2778_v52 = vunpack.c.l.bf16 %v2822_v40  ;;  %v2779_v25 = vunpack.c.h.bf16 %v2822_v40  ;;  %v1800_v53 = vunpack.c.l.bf16 %v1792_v44 }
 0x200   : > { %v1541_v55 = vsel %vm1153_vm12, %v1539_v45, %v1540_v46  ;;  %v1543_v56 = vsel %vm1153_vm12, %v1540_v46, %v1542_v47  ;;  %v1679_v57 = vrot.slane %v1617_v50, 2  ;;  %v1682_v58 = vrot.slane %v1619_v24, 2 }
 0x201   : > { %v1574_v60 = vadd.f32 %v1541_v55, %v1434_v38  ;;  %v1575_v61 = vadd.f32 %v1543_v56, %v1435_v49  ;;  %v1767_v41 = vmul.f32 %v2778_v52, %v3523_v27  ;;  %v1768_v0 = vmul.f32 %v2779_v25, %v3523_v27 }
 0x202   : > { %v1681_v26 = vsel %vm1294_vm13, %v1679_v57, %v1680_v51  ;;  %v1683_v62 = vsel %vm1294_vm13, %v1680_v51, %v1682_v58  ;;  %v1826_v63 = vmul.f32 %v2778_v52, %v3525_v31  ;;  %v1827_v1 = vmul.f32 %v2779_v25, %v3525_v31  ;;  %v2825_v57 = vld [vmem:[%s3924_s9 + $0x18] sm:$0xff]   ;;  %v2824_v58 = vld [vmem:[%s3924_s9 + $0x10] sm:$0xff]  }
 0x203   : > { %v1714_v2 = vadd.f32 %v1681_v26, %v1574_v60  ;;  %v1715_v3 = vadd.f32 %v1683_v62, %v1575_v61  ;;  %v1828_v4 = vmul.f32 %v3525_v31, %v1800_v53  ;;  %v1940_v22 = vunpack.c.l.bf16 %v1932_v59 }
 0x204   : > { %v1888_v12 = vrot.slane %v1826_v63, 1  ;;  %v1889_v5 = vrot.slane %v1827_v1, 1  ;;  %v1967_v7 = vmul.f32 %v2779_v25, %v3527_v33  ;;  %v1968_v21 = vmul.f32 %v3527_v33, %v1800_v53 }
 0x205   : > { %v1783_v27 = vadd.f32 %v1767_v41, %v1714_v2  ;;  %v1784_v8 = vadd.f32 %v1768_v0, %v1715_v3  ;;  %v1891_v9 = vrot.slane %v1828_v4, 1  ;;  %v1966_v10 = vmul.f32 %v3527_v33, %v1940_v22 }
 0x206   : > { %v1890_v13 = vsel %vm1153_vm12, %v1888_v12, %v1889_v5  ;;  %v2029_v14 = vrot.slane %v1967_v7, 2  ;;  %v2031_v15 = vrot.slane %v1968_v21, 2  ;;  %v2782_v39 = vunpack.c.l.bf16 %v2781_v36 }
 0x207   : > { %v1892_v16 = vsel %vm1153_vm12, %v1889_v5, %v1891_v9  ;;  %v1923_v31 = vadd.f32 %v1890_v13, %v1783_v27  ;;  %v2028_v42 = vrot.slane %v1966_v10, 2  ;;  %v2787_v44 = vunpack.c.h.bf16 %v2823_v35  ;;  %v2827_v10 = vld [vmem:[%s3924_s9 + $0x28] sm:$0xff]   ;;  %v2826_v13 = vld [vmem:[%s3924_s9 + $0x20] sm:$0xff]  }
 0x208   : > { %v1924_v17 = vadd.f32 %v1892_v16, %v1784_v8  ;;  %v2032_v20 = vsel %vm1294_vm13, %v2029_v14, %v2031_v15  ;;  %v2783_v49 = vunpack.c.h.bf16 %v2781_v36  ;;  %v2794_v59 = vunpack.c.l.bf16 %v2825_v57 }
 0x209   : > { %v2030_v19 = vsel %vm1294_vm13, %v2028_v42, %v2029_v14  ;;  %v2790_v61 = vunpack.c.l.bf16 %v2824_v58  ;;  %v2795_v26 = vunpack.c.h.bf16 %v2825_v57  ;;  %v2791_v1 = vunpack.c.h.bf16 %v2824_v58 }
 0x20a   : > { %v2063_v23 = vadd.f32 %v2030_v19, %v1923_v31  ;;  %v2064_v54 = vadd.f32 %v2032_v20, %v1924_v17  ;;  %v2802_v14 = vunpack.c.l.bf16 %v2827_v10  ;;  %v2798_v16 = vunpack.c.l.bf16 %v2826_v13 }
 0x20b   : > { %v2803_v17 = vunpack.c.h.bf16 %v2827_v10 }
 0x20c   : > { %v2086_v28 = vadd.f32 %v3885_v18, %v2063_v23  ;;  %v2087_v33 = vadd.f32 %v3885_v18, %v2064_v54  ;;  %v2786_v18 = vunpack.c.l.bf16 %v2823_v35  ;;  %v2799_v23 = vunpack.c.h.bf16 %v2826_v13 }
 0x20e   : > { %v2102_v29 = vmax.f32 %v2086_v28, 0.0  ;;  %v2103_v30 = vmax.f32 %v2087_v33, 0.0 }
 0x210   : > { %v2118_v32 = vmin.f32 %v2102_v29, 6.0  ;;  %v2119_v34 = vmin.f32 %v2103_v30, 6.0 }
 0x212   : > { %v2127_v43 = vpack.c.bf16 %v2119_v34, %v2118_v32 }
 0x214   : > { %2902 = vmatmul.mubr.msk.bf16.gmra.mrb[12].mxu1 %vm2183_vm14, %v2127_v43 }
 0x264   : > { %v2891_v37 = vpop.f32.mrb[0].mxu1 }
 0x265   : > { %v2251_v11 = vadd.f32 %v2891_v37, %v3931_v48  ;;  %v2242_v40 = vpop.f32.mrb[1].mxu1  ;;  %v2829_v37 = vld [vmem:[%s3924_s9 + $0x38] sm:$0xff]  }
 0x266   : > { %v2243_v6 = vadd.f32 %v3931_v48, %v2242_v40  ;;  %v2892_v38 = vpop.f32.mrb[2].mxu1 }
 0x267   : > { %v2342_v45 = vadd.f32 %v2786_v18, %v2251_v11  ;;  %v2254_v46 = vadd.f32 %v2892_v38, %v3931_v48  ;;  %v2245_v47 = vpop.f32.mrb[3].mxu1  ;;  %v2810_v11 = vunpack.c.l.bf16 %v2829_v37 }
 0x268   : > { %v2340_v50 = vadd.f32 %v2782_v39, %v2243_v6  ;;  %v2246_v24 = vadd.f32 %v3931_v48, %v2245_v47  ;;  %v2828_v39 = vld [vmem:[%s3924_s9 + $0x30] sm:$0xff]   ;;  %s3999_s9 = scalar_lea.sflag [#allocation4], %s4074_s21 }
 0x269   : > { %v2717_v51 = vpack.c.bf16 %v2342_v45, %v2342_v45  ;;  %v2343_v52 = vadd.f32 %v2787_v44, %v2254_v46  ;;  %v2806_v44 = vunpack.c.l.bf16 %v2828_v39  ;;  %v2807_v47 = vunpack.c.h.bf16 %v2828_v39 }
 0x26a   : > { %v2715_v25 = vpack.c.bf16 %v2340_v50, %v2340_v50  ;;  %v2341_v53 = vadd.f32 %v2783_v49, %v2246_v24  ;;  %v2811_v49 = vunpack.c.h.bf16 %v2829_v37 }
 0x26b   : > { %2423 = vst.msk [vmem:[%s3284_s17 + $0x8] sm:$0xf] %vm2420_vm15, %v2717_v51  ;;  %v2718_v55 = vpack.c.bf16 %v2343_v52, %v2343_v52 }
 0x26c   : > { %2421 = vst.msk [vmem:[%s3284_s17] sm:$0xf] %vm2420_vm15, %v2715_v25  ;;  %v2716_v56 = vpack.c.bf16 %v2341_v53, %v2341_v53 }
 0x26d   : > { %2424 = vst.msk [vmem:[%s3284_s17 + $0xc] sm:$0xf] %vm2420_vm15, %v2718_v55 }
 0x26e   : > { %2422 = vst.msk [vmem:[%s3284_s17 + $0x4] sm:$0xf] %vm2420_vm15, %v2716_v56 }
 0x290   : > { %v2895_v60 = vpop.f32.mrb[4].mxu1 }
 0x291   : > { %v2267_v41 = vadd.f32 %v2895_v60, %v3931_v48  ;;  %v2258_v0 = vpop.f32.mrb[5].mxu1 }
 0x292   : > { %v2259_v62 = vadd.f32 %v3931_v48, %v2258_v0  ;;  %v2896_v63 = vpop.f32.mrb[6].mxu1 }
 0x293   : > { %v2346_v2 = vadd.f32 %v2794_v59, %v2267_v41  ;;  %v2270_v3 = vadd.f32 %v2896_v63, %v3931_v48  ;;  %v2261_v4 = vpop.f32.mrb[7].mxu1 }
 0x294   : > { %v2344_v22 = vadd.f32 %v2790_v61, %v2259_v62  ;;  %v2262_v12 = vadd.f32 %v3931_v48, %v2261_v4 }
 0x295   : > { %v2721_v5 = vpack.c.bf16 %v2346_v2, %v2346_v2  ;;  %v2347_v7 = vadd.f32 %v2795_v26, %v2270_v3 }
 0x296   : > { %v2719_v21 = vpack.c.bf16 %v2344_v22, %v2344_v22  ;;  %v2345_v27 = vadd.f32 %v2791_v1, %v2262_v12 }
 0x297   : > { %2427 = vst.msk [vmem:[%s3284_s17 + $0x18] sm:$0xf] %vm2420_vm15, %v2721_v5  ;;  %v2722_v8 = vpack.c.bf16 %v2347_v7, %v2347_v7 }
 0x298   : > { %2425 = vst.msk [vmem:[%s3284_s17 + $0x10] sm:$0xf] %vm2420_vm15, %v2719_v21  ;;  %v2720_v9 = vpack.c.bf16 %v2345_v27, %v2345_v27 }
 0x299   : > { %2428 = vst.msk [vmem:[%s3284_s17 + $0x1c] sm:$0xf] %vm2420_vm15, %v2722_v8 }
 0x29a   : > { %2426 = vst.msk [vmem:[%s3284_s17 + $0x14] sm:$0xf] %vm2420_vm15, %v2720_v9 }
 0x2bb   : > { %v2899_v15 = vpop.f32.mrb[8].mxu1 }
 0x2bc   : > { %v2283_v31 = vadd.f32 %v2899_v15, %v3931_v48  ;;  %v2274_v42 = vpop.f32.mrb[9].mxu1 }
 0x2bd   : > { %v2275_v19 = vadd.f32 %v3931_v48, %v2274_v42  ;;  %v2900_v20 = vpop.f32.mrb[10].mxu1 }
 0x2be   : > { %v2350_v54 = vadd.f32 %v2802_v14, %v2283_v31  ;;  %v2286_v28 = vadd.f32 %v2900_v20, %v3931_v48  ;;  %v2277_v33 = vpop.f32.mrb[11].mxu1 }
 0x2bf   : > { %v2348_v29 = vadd.f32 %v2798_v16, %v2275_v19  ;;  %v2278_v30 = vadd.f32 %v3931_v48, %v2277_v33 }
 0x2c0   : > { %v2725_v32 = vpack.c.bf16 %v2350_v54, %v2350_v54  ;;  %v2351_v34 = vadd.f32 %v2803_v17, %v2286_v28 }
 0x2c1   : > { %v2723_v43 = vpack.c.bf16 %v2348_v29, %v2348_v29  ;;  %v2349_v35 = vadd.f32 %v2799_v23, %v2278_v30 }
 0x2c2   : > { %2431 = vst.msk [vmem:[%s3284_s17 + $0x28] sm:$0xf] %vm2420_vm15, %v2725_v32  ;;  %v2726_v36 = vpack.c.bf16 %v2351_v34, %v2351_v34 }
 0x2c3   : > { %2429 = vst.msk [vmem:[%s3284_s17 + $0x20] sm:$0xf] %vm2420_vm15, %v2723_v43  ;;  %v2724_v18 = vpack.c.bf16 %v2349_v35, %v2349_v35 }
 0x2c4   : > { %2432 = vst.msk [vmem:[%s3284_s17 + $0x2c] sm:$0xf] %vm2420_vm15, %v2726_v36 }
 0x2c5   : > { %2430 = vst.msk [vmem:[%s3284_s17 + $0x24] sm:$0xf] %vm2420_vm15, %v2724_v18 }
 0x2e7   : > { %v2903_v40 = vpop.f32.mrb[12].mxu1 }
 0x2e8   : > { %v2299_v6 = vadd.f32 %v2903_v40, %v3931_v48  ;;  %v2290_v38 = vpop.f32.mrb[13].mxu1 }
 0x2e9   : > { %v2291_v45 = vadd.f32 %v3931_v48, %v2290_v38  ;;  %v2904_v46 = vpop.f32.mrb[14].mxu1 }
 0x2ea   : > { %v2354_v50 = vadd.f32 %v2810_v11, %v2299_v6  ;;  %v2302_v24 = vadd.f32 %v2904_v46, %v3931_v48  ;;  %v2293_v51 = vpop.f32.mrb[15].mxu1 }
 0x2eb   : > { %v2352_v52 = vadd.f32 %v2806_v44, %v2291_v45  ;;  %v2294_v25 = vadd.f32 %v3931_v48, %v2293_v51 }
 0x2ec   : > { %v2729_v53 = vpack.c.bf16 %v2354_v50, %v2354_v50  ;;  %v2355_v55 = vadd.f32 %v2811_v49, %v2302_v24 }
 0x2ed   : > { %v2727_v56 = vpack.c.bf16 %v2352_v52, %v2352_v52  ;;  %v2353_v57 = vadd.f32 %v2807_v47, %v2294_v25 }
 0x2ee   : > { %2435 = vst.msk [vmem:[%s3284_s17 + $0x38] sm:$0xf] %vm2420_vm15, %v2729_v53  ;;  %v2730_v58 = vpack.c.bf16 %v2355_v55, %v2355_v55 }
 0x2ef   : > { %2433 = vst.msk [vmem:[%s3284_s17 + $0x30] sm:$0xf] %vm2420_vm15, %v2727_v56  ;;  %v2728_v59 = vpack.c.bf16 %v2353_v57, %v2353_v57 }
 0x2f0   : > { %2436 = vst.msk [vmem:[%s3284_s17 + $0x3c] sm:$0xf] %vm2420_vm15, %v2730_v58 }
 0x2f1   : > { %2434 = vst.msk [vmem:[%s3284_s17 + $0x34] sm:$0xf] %vm2420_vm15, %v2728_v59 }
 0x2f2   : > { %3011 = shalt.err (!%p3008_p11)
}
 0x2f3   : > { %s3012_s17 = scalar_lea.hbm %s3991_s18, 1024  ;;  %s3016_s13 = scalar_lea.hbm %s4058_s7, 4096 }
 0x2f4   : > { %p3013_p12 = scmp.ne.s32.totalorder %s3991_s18, %s3012_s17  ;;  %p3017_p1 = scmp.lt.u32.totalorder %s3991_s18, %s4058_s7 }
 0x2f5   : > { %p3018_p2 = scmp.lt.u32.totalorder %s3016_s13, %s3012_s17  ;;  %p3020_p5 = scmp.lt.u32.totalorder %s3012_s17, %s3991_s18 }
 0x2f6   : > { %p3014_p13 = pnand %p3013_p12, %p3190_p3 }
 0x2f7   : > { %p3019_p4 = por %p3018_p2, %p3017_p1 }
 0x2f8   : > { %p3015_p0 = pneg %p3014_p13 }
 0x2f9   : > { %p3021_p6 = por %p3020_p5, %p3019_p4 }
 0x2fb   : > { %p3022_p7 = pnand %p3021_p6, %p3015_p0 }
 0x2fd   : > { %3025 = shalt.err (!%p3022_p7)
}
 0x2fe   : > { %s3097_s20 = smov 64   ;;  %s3098_s22 = smov 4  }
 0x2ff   : > { %2905 = dma.vmem_to_hbm [thread:$0]  (%p3190_p3), %s3984_s27, 1024, %s3991_s18, %s3999_s9, %s3097_s20, %s3097_s20, %s3098_s22  }
 0x300 PF: > { %p2911_p9 = scmp.ge.s32.totalorder %s3092_s8, 2  ;;  %s2469_s16 = sand.u32 1, %s3064_s24  }
 0x301   : > { %s2470_s0 = scalar_lea.sflag [#allocation4], %s2469_s16 }
 0x302   : > { %p2908_p10 = pnand %p2911_p9, %p3199_p8 }
 0x304   : > { %3059 = dma.done.wait (!%p2908_p10), %s2470_s0, 1024  }
 0x305   : > { %3061 = vsyncadd (!%p2908_p10), %s2470_s0, 4294966272  ;;  %s20_s8 = sadd.s32 1, %s3092_s8   ;;  %s4075_s24 = smov %s3068_s25 }
 0x306   : > { %p17_p11 = scmp.ge.s32.totalorder %s20_s8, 6   ;;  %s4076_s25 = smov %s3072_s26 }
 0x307   : > { %s4077_s26 = smov %s3208_s19  ;;  %s4078_s27 = smov %s3084_s29 }
 0x308   : > { %s4079_s28 = smov %s3088_s30  ;;  %s4080_s29 = smov %s4083_s11 }
 0x309   : > { %s4081_s30 = smov %s4087_s12  ;;  %19 = sbr.rel (!%p17_p11) target bundleno = 7 (0x7), region = 98 }
 0x310   :  { %2475 = vsyncpa [#allocation4], 1 }
 0x311   :  { %2477 = vsyncpa [#allocation4 + $0x1], 1 }

</bundles_post_ra>
